<compile_context>
chip_gen: v5e
topology: v5e:2x2
jax: 0.10.0
libtpu: 0.0.40
codegen_flags: <defaults>
</compile_context>

<pallas_src>
import functools

import jax
import jax.numpy as jnp
from jax.experimental import pallas as pl
from jax.experimental.pallas import tpu as pltpu


def _round_up(x, m):
    return (x + m - 1) // m * m


def _sub_tile(parent, target):
    """Largest multiple of 128 that divides `parent` (itself a multiple of 128)
    and is <= target; falls back to 128."""
    t = (min(target, parent) // 128) * 128
    while t > 128 and parent % t != 0:
        t -= 128
    return max(t, 128)


def _mosaic_params(dims, block_bytes):
    # block_bytes already includes double buffering; add fixed headroom.
    # Floor at 32 MiB (v5e's default scoped limit is only 16 MiB), cap at
    # 56 MiB so the same setting stays inside v7x's 64 MiB/TC physical VMEM
    # (v5e/v6e have 128 MiB, so 56 MiB is always safe there too).
    limit = int(min(max(block_bytes + (16 << 20), 32 << 20), 56 << 20))
    return pltpu.CompilerParams(dimension_semantics=dims,
                                vmem_limit_bytes=limit)


# ---------------------------------------------------------------------------
# Kernel A: im2col matmul (bf16 in, f32 accum) + fused BN batch statistics
# ---------------------------------------------------------------------------
def _conv_matmul_stats_kernel(p_ref, w_ref, o_ref, sum_ref, sq_ref, acc_ref):
    # grid = (M blocks, OC blocks, K blocks); K innermost (reduction).
    k = pl.program_id(2)

    @pl.when(k == 0)
    def _():
        acc_ref[...] = jnp.zeros_like(acc_ref)

    acc_ref[...] += jnp.dot(p_ref[...], w_ref[...],
                            preferred_element_type=jnp.float32)

    @pl.when(k == pl.num_programs(2) - 1)
    def _():
        acc = acc_ref[...]
        # Conv output stored as bf16: halves this kernel's HBM write and
        # kernel B's read; the BN stats below still use the f32 accumulator.
        o_ref[...] = acc.astype(o_ref.dtype)
        # Per-(M-block, OC-block) partial statistics, written exactly once per
        # grid point (reduced over M blocks in JAX afterwards).  Padded M rows
        # are all-zero patches, so they contribute 0 to both sums.
        sum_ref[...] = jnp.sum(acc, axis=0, keepdims=True)[None]
        sq_ref[...] = jnp.sum(acc * acc, axis=0, keepdims=True)[None]


def _conv_matmul_stats(patches_p, weight_p, *, tm, tn, tk):
    Mp, Kp = patches_p.shape
    _, OCp = weight_p.shape
    nm, nn, nk = Mp // tm, OCp // tn, Kp // tk

    block_bytes = (
        2 * tm * tk * 2        # patch blocks (bf16, double buffered)
        + 2 * tk * tn * 2      # weight blocks (bf16)
        + 2 * tm * tn * 2      # conv-output blocks (bf16)
        + tm * tn * 4          # f32 accumulator scratch
        + 4 * 2 * tn * 4)      # stat output blocks

    return pl.pallas_call(
        _conv_matmul_stats_kernel,
        out_shape=(
            jax.ShapeDtypeStruct((Mp, OCp), jnp.bfloat16),     # conv output
            jax.ShapeDtypeStruct((nm, 1, OCp), jnp.float32),   # partial sums
            jax.ShapeDtypeStruct((nm, 1, OCp), jnp.float32),   # partial sumsq
        ),
        grid_spec=pltpu.PrefetchScalarGridSpec(
            num_scalar_prefetch=0,
            grid=(nm, nn, nk),
            in_specs=[
                pl.BlockSpec((tm, tk), lambda i, j, k: (i, k)),
                pl.BlockSpec((tk, tn), lambda i, j, k: (k, j)),
            ],
            out_specs=(
                pl.BlockSpec((tm, tn), lambda i, j, k: (i, j)),
                pl.BlockSpec((1, 1, tn), lambda i, j, k: (i, 0, j)),
                pl.BlockSpec((1, 1, tn), lambda i, j, k: (i, 0, j)),
            ),
            scratch_shapes=[pltpu.VMEM((tm, tn), jnp.float32)],
        ),
        # Stats are per-M-block partials, so both M and OC are independent
        # ("parallel"): v7x megacore shards over M even when OC fits in one
        # tn block.  K is the reduction ("arbitrary").
        compiler_params=_mosaic_params(
            ("parallel", "parallel", "arbitrary"), block_bytes),
    )(patches_p, weight_p)


# ---------------------------------------------------------------------------
# Kernel B: fused BatchNorm affine (+ optional ReLU) + transpose to (OC, M)
# ---------------------------------------------------------------------------
def _bn_relu_t_kernel(x_ref, scale_ref, shift_ref, o_ref, *, apply_relu):
    y = x_ref[...].astype(jnp.float32) * scale_ref[...] + shift_ref[...]
    if apply_relu:
        y = jnp.maximum(y, 0.0)
    # Emit the transposed (OC, M) layout so the final NCHW rearrangement in
    # the wrapper is a cheap major-axis permute (no lane relayout).  The XLU
    # transpose is free here: this kernel is HBM-bound.
    o_ref[...] = y.T


def _bn_relu_transpose(conv_p, scale_p, shift_p, *, tm, tn, apply_relu):
    Mp, OCp = conv_p.shape
    block_bytes = 2 * tm * tn * 2 + 2 * tn * tm * 4 + 4 * 2 * tn * 4
    kernel = functools.partial(_bn_relu_t_kernel, apply_relu=apply_relu)
    return pl.pallas_call(
        kernel,
        out_shape=jax.ShapeDtypeStruct((OCp, Mp), jnp.float32),
        grid_spec=pltpu.PrefetchScalarGridSpec(
            num_scalar_prefetch=0,
            grid=(Mp // tm, OCp // tn),
            in_specs=[
                pl.BlockSpec((tm, tn), lambda i, j: (i, j)),
                pl.BlockSpec((1, tn), lambda i, j: (0, j)),
                pl.BlockSpec((1, tn), lambda i, j: (0, j)),
            ],
            out_specs=pl.BlockSpec((tn, tm), lambda i, j: (j, i)),
        ),
        compiler_params=_mosaic_params(("parallel", "parallel"), block_bytes),
    )(conv_p, scale_p, shift_p)


# ---------------------------------------------------------------------------
# im2col (plain-JAX glue) with lane-dense feature order: K = (kh, kw, c)
# ---------------------------------------------------------------------------
def _im2col(x_nchw, kh, kw, stride, padding):
    n, c, h, w = x_nchw.shape
    x = jnp.transpose(x_nchw, (0, 2, 3, 1))                  # NHWC (C on lanes)
    if padding:
        x = jnp.pad(x, ((0, 0), (padding, padding),
                        (padding, padding), (0, 0)))
    oh = (h + 2 * padding - kh) // stride + 1
    ow = (w + 2 * padding - kw) // stride + 1
    cols = []
    for i in range(kh):
        for j in range(kw):
            cols.append(
                x[:, i:i + oh * stride:stride, j:j + ow * stride:stride, :])
    # Concatenate taps along the channel axis: C stays the last (lane) dim,
    # so the reshape below is contiguous (no XLA relayout, no masked stores).
    patches = jnp.concatenate(cols, axis=-1)                  # (N,OH,OW,KH*KW*C)
    return patches.reshape(n * oh * ow, kh * kw * c), oh, ow


# ---------------------------------------------------------------------------
# BasicConv forward
# ---------------------------------------------------------------------------
def basic_conv_forward(x, params, *, kernel_size, stride=1, padding=0,
                       relu=True, bn=True, eps=1e-5,
                       tm=2048, tn=1024, tk=512, tmb=512, tnb=256):
    """x: (N, C, H, W) f32 -> (N, OC, OH, OW) f32 (PyTorch training-mode BN)."""
    # TODO(synk): dilation != 1 and groups != 1 are not implemented (module
    # defaults are 1); a fully fused shift-and-matmul kernel would also remove
    # the materialized im2col matrix.
    del kernel_size                                           # from weight shape
    weight = params["weight"]                                 # (OC, C, KH, KW)
    oc, c, kh, kw = weight.shape
    n = x.shape[0]

    # bf16 im2col: halves the dominant HBM traffic on the (KH*KW x input)-sized
    # patch matrix; f32 accumulation inside kernel A preserves the reduction.
    patches, oh, ow = _im2col(x.astype(jnp.bfloat16), kh, kw, stride, padding)
    m, k = patches.shape
    # Weight in matching (kh, kw, c) feature order.
    w2d = jnp.transpose(weight, (0, 2, 3, 1)).reshape(oc, k).T  # (K, OC)
    w2d = w2d.astype(jnp.bfloat16)

    # Tile selection: large tm/tn keep the K loop MXU-bound
    # (AI = tm*tn/(tm+tn) ~ 683 FLOP/B at the defaults, above the HBM
    # crossover on v5e/v6e/v7x) while total blocks stay ~22 MiB of VMEM.
    tm = min(tm, _round_up(m, 128))
    tn = min(tn, _round_up(oc, 128))
    kp128 = _round_up(k, 128)
    tk = kp128 if kp128 <= 1024 else min(tk, kp128)   # small K: single K step
    mp, kp, ocp = _round_up(m, tm), _round_up(k, tk), _round_up(oc, tn)

    patches_p = jnp.pad(patches, ((0, mp - m), (0, kp - k)))
    w_p = jnp.pad(w2d, ((0, kp - k), (0, ocp - oc)))

    conv_p, part_sum, part_sq = _conv_matmul_stats(patches_p, w_p,
                                                   tm=tm, tn=tn, tk=tk)

    if bn:
        inv_m = 1.0 / m
        ch_sum = jnp.sum(part_sum[:, 0, :oc], axis=0)
        ch_sq = jnp.sum(part_sq[:, 0, :oc], axis=0)
        mean = ch_sum * inv_m
        # One-pass biased variance E[x^2] - E[x]^2 (f32 accumulation in the
        # matmul epilogue); clamp against tiny negative cancellation.
        var = jnp.maximum(ch_sq * inv_m - mean * mean, 0.0)
        scale = params["gamma"] / jnp.sqrt(var + eps)
        shift = params["beta"] - mean * scale
    else:
        scale = jnp.ones((oc,), jnp.float32)
        shift = jnp.zeros((oc,), jnp.float32)

    scale_p = jnp.pad(scale[None, :].astype(jnp.float32),
                      ((0, 0), (0, ocp - oc)))
    shift_p = jnp.pad(shift[None, :].astype(jnp.float32),
                      ((0, 0), (0, ocp - oc)))

    # Kernel B: decoupled, small tiles (pure HBM streaming), emits (OC, M).
    # It also up-casts back to f32 and folds the layout transpose, so it runs
    # even when bn=False / relu=False.
    tmb = _sub_tile(mp, tmb)
    tnb = _sub_tile(ocp, tnb)
    out_t = _bn_relu_transpose(conv_p, scale_p, shift_p,
                               tm=tmb, tn=tnb, apply_relu=relu)

    # (OCp, Mp) -> (N, OC, OH, OW): slice + *major-axis* permute only (the lane
    # dim is untouched) -- much cheaper than the former NHWC->NCHW relayout.
    out = out_t[:oc, :m].reshape(oc, n, oh, ow)
    return jnp.transpose(out, (1, 0, 2, 3))


# ---------------------------------------------------------------------------
# Reference (pure JAX, f32) for verification
# ---------------------------------------------------------------------------
def basic_conv_reference(x, params, *, stride, padding, relu=True, bn=True,
                         eps=1e-5):
    w = params["weight"]
    y = jax.lax.conv_general_dilated(
        x, w, window_strides=(stride, stride),
        padding=((padding, padding), (padding, padding)),
        dimension_numbers=("NCHW", "OIHW", "NCHW"))
    if bn:
        mean = jnp.mean(y, axis=(0, 2, 3), keepdims=True)
        var = jnp.mean((y - mean) ** 2, axis=(0, 2, 3), keepdims=True)
        y = (y - mean) / jnp.sqrt(var + eps)
        y = (y * params["gamma"][None, :, None, None]
             + params["beta"][None, :, None, None])
    if relu:
        y = jnp.maximum(y, 0.0)
    return y


if __name__ == "__main__":
    key = jax.random.PRNGKey(0)
    k_x, k_w, k_g, k_b = jax.random.split(key, 4)

    # Shapes consistent with BasicConv(in=4, out=8, kernel=3, pad=1)
    N, C, H, W = 2, 4, 16, 16
    OC, KH, KW = 8, 3, 3
    STRIDE, PAD = 1, 1

    x = jax.random.normal(k_x, (N, C, H, W), dtype=jnp.float32)
    params = {
        "weight": jax.random.normal(k_w, (OC, C, KH, KW), jnp.float32) * 0.1,
        "gamma": 1.0 + 0.1 * jax.random.normal(k_g, (OC,), jnp.float32),
        "beta": 0.1 * jax.random.normal(k_b, (OC,), jnp.float32),
    }

    fwd = jax.jit(functools.partial(
        basic_conv_forward, kernel_size=KH, stride=STRIDE, padding=PAD,
        relu=True, bn=True))
    out = jax.block_until_ready(fwd(x, params))

    ref = basic_conv_reference(x, params, stride=STRIDE, padding=PAD,
                               relu=True, bn=True)
    assert out.shape == (N, OC, H, W), out.shape
    err = float(jnp.max(jnp.abs(out - ref)))
    # bf16 MXU inputs + bf16 conv-output storage (f32 accumulation/statistics)
    # vs f32 reference -> loosened tolerance.
    assert jnp.allclose(out, ref, atol=4e-2, rtol=4e-2), err

    print("KERNEL_OK")
</pallas_src>

<mosaic_0001>
module attributes {stable_mosaic.version = 11 : i64} {
  func.func @_conv_matmul_stats_kernel(%arg0: i32, %arg1: i32, %arg2: i32, %arg3: memref<512x128xbf16, #tpu.memory_space<vmem>>, %arg4: memref<128x128xbf16, #tpu.memory_space<vmem>>, %arg5: memref<512x128xbf16, #tpu.memory_space<vmem>>, %arg6: memref<1x1x128xf32, #tpu.memory_space<vmem>>, %arg7: memref<1x1x128xf32, #tpu.memory_space<vmem>>, %arg8: memref<512x128xf32, #tpu.memory_space<vmem>>) attributes {dimension_semantics = [#tpu.dimension_semantics<parallel>, #tpu.dimension_semantics<parallel>, #tpu.dimension_semantics<arbitrary>], iteration_bounds = array<i64: 1, 1, 1>, scalar_prefetch = 0 : i64, scratch_operands = 1 : i64, tpu.core_type = #tpu.core_type<tc>, window_params = [{transform_indices = @transform_0, window_bounds = array<i64: 512, 128>}, {transform_indices = @transform_1, window_bounds = array<i64: 128, 128>}, {transform_indices = @transform_2, window_bounds = array<i64: 512, 128>}, {transform_indices = @transform_3, window_bounds = array<i64: 1, 1, 128>}, {transform_indices = @transform_4, window_bounds = array<i64: 1, 1, 128>}]} {
    %c0_i32 = arith.constant 0 : i32
    %0 = arith.cmpi eq, %arg2, %c0_i32 : i32
    %1 = arith.extui %0 : i1 to i32
    %c0_i32_0 = arith.constant 0 : i32
    %2 = arith.cmpi ne, %1, %c0_i32_0 : i32
    scf.if %2 {
      %cst_10 = arith.constant 0.000000e+00 : f32
      %12 = vector.broadcast %cst_10 : f32 to vector<512x128xf32>
      %c0_11 = arith.constant 0 : index
      %c0_12 = arith.constant 0 : index
      %13 = vector.load %arg8[%c0_11, %c0_12] : memref<512x128xf32, #tpu.memory_space<vmem>>, vector<512x128xf32>
      tpu.vector_store %arg8[%c0_11, %c0_12], %12 {strides = array<i32>} : memref<512x128xf32, #tpu.memory_space<vmem>>, vector<512x128xf32>,
    } else {
    }
    %c0 = arith.constant 0 : index
    %c0_1 = arith.constant 0 : index
    %3 = vector.load %arg8[%c0, %c0_1] : memref<512x128xf32, #tpu.memory_space<vmem>>, vector<512x128xf32>
    %c0_2 = arith.constant 0 : index
    %c0_3 = arith.constant 0 : index
    %4 = vector.load %arg3[%c0_2, %c0_3] : memref<512x128xbf16, #tpu.memory_space<vmem>>, vector<512x128xbf16>
    %c0_4 = arith.constant 0 : index
    %c0_5 = arith.constant 0 : index
    %5 = vector.load %arg4[%c0_4, %c0_5] : memref<128x128xbf16, #tpu.memory_space<vmem>>, vector<128x128xbf16>
    %cst = arith.constant dense<0.000000e+00> : vector<512x128xf32>
    %6 = tpu.matmul %4, %5, %cst {dimension_numbers = #tpu.dot_dimension_numbers<[1], [0], [0], [1], [0, 0, 1, 1], [], []>} : vector<512x128xbf16>, vector<128x128xbf16>, vector<512x128xf32> -> vector<512x128xf32>
    %7 = arith.addf %3, %6 : vector<512x128xf32>
    %c0_6 = arith.constant 0 : index
    %c0_7 = arith.constant 0 : index
    %8 = vector.load %arg8[%c0_6, %c0_7] : memref<512x128xf32, #tpu.memory_space<vmem>>, vector<512x128xf32>
    tpu.vector_store %arg8[%c0_6, %c0_7], %7 {strides = array<i32>} : memref<512x128xf32, #tpu.memory_space<vmem>>, vector<512x128xf32>,
    %c0_i32_8 = arith.constant 0 : i32
    %9 = arith.cmpi eq, %arg2, %c0_i32_8 : i32
    %10 = arith.extui %9 : i1 to i32
    %c0_i32_9 = arith.constant 0 : i32
    %11 = arith.cmpi ne, %10, %c0_i32_9 : i32
    scf.if %11 {
      %c0_10 = arith.constant 0 : index
      %c0_11 = arith.constant 0 : index
      %12 = vector.load %arg8[%c0_10, %c0_11] : memref<512x128xf32, #tpu.memory_space<vmem>>, vector<512x128xf32>
      %13 = arith.truncf %12 : vector<512x128xf32> to vector<512x128xbf16>
      %c0_12 = arith.constant 0 : index
      %c0_13 = arith.constant 0 : index
      %14 = vector.load %arg5[%c0_12, %c0_13] : memref<512x128xbf16, #tpu.memory_space<vmem>>, vector<512x128xbf16>
      tpu.vector_store %arg5[%c0_12, %c0_13], %13 {strides = array<i32>} : memref<512x128xbf16, #tpu.memory_space<vmem>>, vector<512x128xbf16>,
      %cst_14 = arith.constant dense<0.000000e+00> : vector<128xf32>
      %15 = vector.multi_reduction <add>, %12, %cst_14 [0] : vector<512x128xf32> to vector<128xf32>
      %16 = vector.shape_cast %15 : vector<128xf32> to vector<1x128xf32>
      %17 = vector.shape_cast %16 : vector<1x128xf32> to vector<1x1x128xf32>
      %c0_15 = arith.constant 0 : index
      %c0_16 = arith.constant 0 : index
      %c0_17 = arith.constant 0 : index
      %18 = vector.load %arg6[%c0_15, %c0_16, %c0_17] : memref<1x1x128xf32, #tpu.memory_space<vmem>>, vector<1x1x128xf32>
      tpu.vector_store %arg6[%c0_15, %c0_16, %c0_17], %17 {strides = array<i32>} : memref<1x1x128xf32, #tpu.memory_space<vmem>>, vector<1x1x128xf32>,
      %19 = arith.mulf %12, %12 : vector<512x128xf32>
      %cst_18 = arith.constant dense<0.000000e+00> : vector<128xf32>
      %20 = vector.multi_reduction <add>, %19, %cst_18 [0] : vector<512x128xf32> to vector<128xf32>
      %21 = vector.shape_cast %20 : vector<128xf32> to vector<1x128xf32>
      %22 = vector.shape_cast %21 : vector<1x128xf32> to vector<1x1x128xf32>
      %c0_19 = arith.constant 0 : index
      %c0_20 = arith.constant 0 : index
      %c0_21 = arith.constant 0 : index
      %23 = vector.load %arg7[%c0_19, %c0_20, %c0_21] : memref<1x1x128xf32, #tpu.memory_space<vmem>>, vector<1x1x128xf32>
      tpu.vector_store %arg7[%c0_19, %c0_20, %c0_21], %22 {strides = array<i32>} : memref<1x1x128xf32, #tpu.memory_space<vmem>>, vector<1x1x128xf32>,
    } else {
    }
    return
  }
  func.func @transform_0(%arg0: i32, %arg1: i32, %arg2: i32) -> (i32, i32) {
    %c0_i32 = arith.constant 0 : i32
    return %arg0, %arg2 : i32, i32
  }
  func.func @transform_1(%arg0: i32, %arg1: i32, %arg2: i32) -> (i32, i32) {
    %c0_i32 = arith.constant 0 : i32
    return %arg2, %arg1 : i32, i32
  }
  func.func @transform_2(%arg0: i32, %arg1: i32, %arg2: i32) -> (i32, i32) {
    %c0_i32 = arith.constant 0 : i32
    return %arg0, %arg1 : i32, i32
  }
  func.func @transform_3(%arg0: i32, %arg1: i32, %arg2: i32) -> (i32, i32, i32) {
    %c0_i32 = arith.constant 0 : i32
    %c0_i32_0 = arith.constant 0 : i32
    return %arg0, %c0_i32, %arg1 : i32, i32, i32
  }
  func.func @transform_4(%arg0: i32, %arg1: i32, %arg2: i32) -> (i32, i32, i32) {
    %c0_i32 = arith.constant 0 : i32
    %c0_i32_0 = arith.constant 0 : i32
    return %arg0, %c0_i32, %arg1 : i32, i32, i32
  }
}

module attributes {stable_mosaic.version = 11 : i64} {
  func.func @_bn_relu_t_kernel(%arg0: i32, %arg1: i32, %arg2: memref<512x128xbf16, #tpu.memory_space<vmem>>, %arg3: memref<1x128xf32, #tpu.memory_space<vmem>>, %arg4: memref<1x128xf32, #tpu.memory_space<vmem>>, %arg5: memref<128x512xf32, #tpu.memory_space<vmem>>) attributes {dimension_semantics = [#tpu.dimension_semantics<parallel>, #tpu.dimension_semantics<parallel>], iteration_bounds = array<i64: 1, 1>, scalar_prefetch = 0 : i64, scratch_operands = 0 : i64, tpu.core_type = #tpu.core_type<tc>, window_params = [{transform_indices = @transform_0, window_bounds = array<i64: 512, 128>}, {transform_indices = @transform_1, window_bounds = array<i64: 1, 128>}, {transform_indices = @transform_2, window_bounds = array<i64: 1, 128>}, {transform_indices = @transform_3, window_bounds = array<i64: 128, 512>}]} {
    %c0 = arith.constant 0 : index
    %c0_0 = arith.constant 0 : index
    %0 = vector.load %arg2[%c0, %c0_0] : memref<512x128xbf16, #tpu.memory_space<vmem>>, vector<512x128xbf16>
    %1 = arith.extf %0 : vector<512x128xbf16> to vector<512x128xf32>
    %c0_1 = arith.constant 0 : index
    %c0_2 = arith.constant 0 : index
    %2 = vector.load %arg3[%c0_1, %c0_2] : memref<1x128xf32, #tpu.memory_space<vmem>>, vector<1x128xf32>
    %3 = vector.broadcast %2 : vector<1x128xf32> to vector<512x128xf32>
    %4 = arith.mulf %1, %3 : vector<512x128xf32>
    %c0_3 = arith.constant 0 : index
    %c0_4 = arith.constant 0 : index
    %5 = vector.load %arg4[%c0_3, %c0_4] : memref<1x128xf32, #tpu.memory_space<vmem>>, vector<1x128xf32>
    %6 = vector.broadcast %5 : vector<1x128xf32> to vector<512x128xf32>
    %7 = arith.addf %4, %6 : vector<512x128xf32>
    %cst = arith.constant 0.000000e+00 : f32
    %8 = vector.broadcast %cst : f32 to vector<512x128xf32>
    %9 = arith.maximumf %7, %8 : vector<512x128xf32>
    %10 = tpu.transpose %9, [1, 0] : vector<512x128xf32> -> vector<128x512xf32>
    %c0_5 = arith.constant 0 : index
    %c0_6 = arith.constant 0 : index
    %11 = vector.load %arg5[%c0_5, %c0_6] : memref<128x512xf32, #tpu.memory_space<vmem>>, vector<128x512xf32>
    tpu.vector_store %arg5[%c0_5, %c0_6], %10 {strides = array<i32>} : memref<128x512xf32, #tpu.memory_space<vmem>>, vector<128x512xf32>,
    return
  }
  func.func @transform_0(%arg0: i32, %arg1: i32) -> (i32, i32) {
    %c0_i32 = arith.constant 0 : i32
    return %arg0, %arg1 : i32, i32
  }
  func.func @transform_1(%arg0: i32, %arg1: i32) -> (i32, i32) {
    %c0_i32 = arith.constant 0 : i32
    %c0_i32_0 = arith.constant 0 : i32
    return %c0_i32, %arg1 : i32, i32
  }
  func.func @transform_2(%arg0: i32, %arg1: i32) -> (i32, i32) {
    %c0_i32 = arith.constant 0 : i32
    %c0_i32_0 = arith.constant 0 : i32
    return %c0_i32, %arg1 : i32, i32
  }
  func.func @transform_3(%arg0: i32, %arg1: i32) -> (i32, i32) {
    %c0_i32 = arith.constant 0 : i32
    return %arg1, %arg0 : i32, i32
  }
}

</mosaic_0001>

<bundles_post_ra>
// kernel: basic_conv_forward.3
= control target key start
LH: loop header
LB: loop body
LE: loop exit
PB: predicated region body
PF: predicated region fallthrough
CT: control target
= control target key end

     0   :  { %s1145_s0 = inlined_call_operand.vmem [shape: bf16[512,128], index: 0, kind: input, shape index: {}]   ;;  %s1146_s1 = inlined_call_operand.vmem [shape: f32[1,128], index: 1, kind: input, shape index: {}]   ;;  %s1147_s2 = inlined_call_operand.vmem [shape: f32[1,128], index: 2, kind: input, shape index: {}]   ;;  %s1148_s3 = inlined_call_operand.vmem [shape: f32[128,512], index: 3, kind: output, shape index: {}]  }
   0x1   :  { %v539_v0 = vld [vmem:[%s1145_s0] sm:$0xff]   ;;  %v666_v8 = vld [vmem:[%s1145_s0 + $0x8] sm:$0xff]   ;;  %v667_v18 = vld [vmem:[%s1145_s0 + $0x10] sm:$0xff]  }
   0x2   :  { %v725_v1 = vld [vmem:[%s1146_s1] ss:$0 sm:$0xff]  ;;  %v540_v2 = vunpack.c.l.bf16 %v539_v0  ;;  %v541_v4 = vunpack.c.h.bf16 %v539_v0  ;;  %v544_v11 = vunpack.c.l.bf16 %v666_v8  ;;  %v545_v15 = vunpack.c.h.bf16 %v666_v8  ;;  %v668_v27 = vld [vmem:[%s1145_s0 + $0x18] sm:$0xff]   ;;  %v670_v45 = vld [vmem:[%s1145_s0 + $0x28] sm:$0xff]  }
   0x3   :  { %v730_v3 = vld [vmem:[%s1147_s2] ss:$0 sm:$0xff]  ;;  %v548_v20 = vunpack.c.l.bf16 %v667_v18  ;;  %v549_v24 = vunpack.c.h.bf16 %v667_v18  ;;  %v552_v29 = vunpack.c.l.bf16 %v668_v27  ;;  %v553_v33 = vunpack.c.h.bf16 %v668_v27  ;;  %v671_v54 = vld [vmem:[%s1145_s0 + $0x30] sm:$0xff]  }
   0x4   :  { %v146_v5 = vmul.f32 %v725_v1, %v540_v2  ;;  %v147_v7 = vmul.f32 %v725_v1, %v541_v4  ;;  %v148_v13 = vmul.f32 %v725_v1, %v544_v11  ;;  %v149_v17 = vmul.f32 %v725_v1, %v545_v15  ;;  %v669_v36 = vld [vmem:[%s1145_s0 + $0x20] sm:$0xff]  }
   0x5   :  { %v150_v22 = vmul.f32 %v725_v1, %v548_v20  ;;  %v151_v26 = vmul.f32 %v725_v1, %v549_v24  ;;  %v152_v31 = vmul.f32 %v725_v1, %v552_v29  ;;  %v153_v35 = vmul.f32 %v725_v1, %v553_v33  ;;  %v673_v59 = vld [vmem:[%s1145_s0 + $0x40] sm:$0xff]  }
   0x6   :  { %v214_v6 = vadd.f32 %v730_v3, %v146_v5  ;;  %v215_v10 = vadd.f32 %v730_v3, %v147_v7  ;;  %v216_v14 = vadd.f32 %v730_v3, %v148_v13  ;;  %v217_v19 = vadd.f32 %v730_v3, %v149_v17  ;;  %v672_v5 = vld [vmem:[%s1145_s0 + $0x38] sm:$0xff]   ;;  %v681_v11 = vld [vmem:[%s1145_s0 + $0x80] sm:$0xff]  }
   0x7   :  { %v218_v23 = vadd.f32 %v730_v3, %v150_v22  ;;  %v219_v28 = vadd.f32 %v730_v3, %v151_v26  ;;  %v220_v32 = vadd.f32 %v730_v3, %v152_v31  ;;  %v221_v37 = vadd.f32 %v730_v3, %v153_v35  ;;  %v689_v29 = vld [vmem:[%s1145_s0 + $0xc0] sm:$0xff]  }
   0x8   :  { %v278_v9 = vmax.f32 %v214_v6, 0.0  ;;  %v279_v12 = vmax.f32 %v215_v10, 0.0  ;;  %v280_v16 = vmax.f32 %v216_v14, 0.0  ;;  %v281_v21 = vmax.f32 %v217_v19, 0.0  ;;  %v674_v19 = vld [vmem:[%s1145_s0 + $0x48] sm:$0xff]  }
   0x9   :  { %v282_v25 = vmax.f32 %v218_v23, 0.0  ;;  %v283_v30 = vmax.f32 %v219_v28, 0.0  ;;  %v284_v34 = vmax.f32 %v220_v32, 0.0  ;;  %v556_v38 = vunpack.c.l.bf16 %v669_v36 }
   0xa   :  { %342 = vxpose.xlu0.b32.start [1/16] %v278_v9, 128  ;;  %v285_v39 = vmax.f32 %v221_v37, 0.0  ;;  %v557_v42 = vunpack.c.h.bf16 %v669_v36  ;;  %v560_v47 = vunpack.c.l.bf16 %v670_v45  ;;  %v561_v51 = vunpack.c.h.bf16 %v670_v45 }
   0xb   :  { %v154_v40 = vmul.f32 %v725_v1, %v556_v38  ;;  %v564_v56 = vunpack.c.l.bf16 %v671_v54  ;;  %v565_v61 = vunpack.c.h.bf16 %v671_v54  ;;  %v572_v62 = vunpack.c.l.bf16 %v673_v59  ;;  %v682_v38 = vld [vmem:[%s1145_s0 + $0x88] sm:$0xff]  }
   0xc   :  { %v155_v44 = vmul.f32 %v725_v1, %v557_v42  ;;  %v156_v49 = vmul.f32 %v725_v1, %v560_v47  ;;  %v157_v53 = vmul.f32 %v725_v1, %v561_v51  ;;  %v568_v8 = vunpack.c.l.bf16 %v672_v5 }
   0xd   :  { %v222_v41 = vadd.f32 %v730_v3, %v154_v40  ;;  %v158_v58 = vmul.f32 %v725_v1, %v564_v56  ;;  %v162_v63 = vmul.f32 %v725_v1, %v572_v62  ;;  %v159_v2 = vmul.f32 %v725_v1, %v565_v61  ;;  %v690_v56 = vld [vmem:[%s1145_s0 + $0xc8] sm:$0xff]  }
   0xe   :  { %v223_v46 = vadd.f32 %v730_v3, %v155_v44  ;;  %v224_v50 = vadd.f32 %v730_v3, %v156_v49  ;;  %v225_v55 = vadd.f32 %v730_v3, %v157_v53  ;;  %v573_v9 = vunpack.c.h.bf16 %v673_v59 }
   0xf   :  { %v286_v43 = vmax.f32 %v222_v41, 0.0  ;;  %v226_v60 = vadd.f32 %v730_v3, %v158_v58  ;;  %v230_v4 = vadd.f32 %v730_v3, %v162_v63  ;;  %v227_v7 = vadd.f32 %v730_v3, %v159_v2  ;;  %v683_v2 = vld [vmem:[%s1145_s0 + $0x90] sm:$0xff]  }
  0x10   :  { %v287_v48 = vmax.f32 %v223_v46, 0.0  ;;  %v288_v52 = vmax.f32 %v224_v50, 0.0  ;;  %v289_v57 = vmax.f32 %v225_v55, 0.0  ;;  %v163_v10 = vmul.f32 %v725_v1, %v573_v9  ;;  %v675_v46 = vld [vmem:[%s1145_s0 + $0x50] sm:$0xff]  }
  0x11   :  { %v290_v0 = vmax.f32 %v226_v60, 0.0  ;;  %v294_v6 = vmax.f32 %v230_v4, 0.0  ;;  %v291_v13 = vmax.f32 %v227_v7, 0.0  ;;  %v160_v14 = vmul.f32 %v725_v1, %v568_v8 }
  0x12   :  { %343 = vxpose.xlu0.b32.cont [2/16] %v279_v12, 128  ;;  %v604_v12 = vunpack.c.l.bf16 %v681_v11  ;;  %v231_v15 = vadd.f32 %v730_v3, %v163_v10  ;;  %v576_v22 = vunpack.c.l.bf16 %v674_v19  ;;  %v577_v35 = vunpack.c.h.bf16 %v674_v19 }
  0x13   :  { %374 = vxpose.xlu1.b32.start [1/16] %v294_v6, 128  ;;  %v228_v20 = vadd.f32 %v730_v3, %v160_v14  ;;  %v637_v47 = vunpack.c.h.bf16 %v689_v29  ;;  %v580_v49 = vunpack.c.l.bf16 %v675_v46  ;;  %v640_v61 = vunpack.c.l.bf16 %v690_v56 }
  0x14   :  { %v295_v17 = vmax.f32 %v231_v15, 0.0  ;;  %v164_v24 = vmul.f32 %v725_v1, %v576_v22  ;;  %v165_v37 = vmul.f32 %v725_v1, %v577_v35  ;;  %v581_v62 = vunpack.c.h.bf16 %v675_v46 }
  0x15   :  { %v292_v26 = vmax.f32 %v228_v20, 0.0  ;;  %v166_v51 = vmul.f32 %v725_v1, %v580_v49  ;;  %v195_v54 = vmul.f32 %v725_v1, %v637_v47  ;;  %v612_v4 = vunpack.c.l.bf16 %v683_v2 }
  0x16   :  { %v232_v28 = vadd.f32 %v730_v3, %v164_v24  ;;  %v233_v42 = vadd.f32 %v730_v3, %v165_v37  ;;  %v196_v6 = vmul.f32 %v725_v1, %v640_v61 }
  0x17   :  { %v234_v55 = vadd.f32 %v730_v3, %v166_v51  ;;  %v263_v60 = vadd.f32 %v730_v3, %v195_v54  ;;  %v182_v8 = vmul.f32 %v725_v1, %v612_v4  ;;  %v678_v4 = vld [vmem:[%s1145_s0 + $0x68] sm:$0xff]  }
  0x18   :  { %v296_v31 = vmax.f32 %v232_v28, 0.0  ;;  %v297_v44 = vmax.f32 %v233_v42, 0.0 }
  0x19   :  { %v298_v58 = vmax.f32 %v234_v55, 0.0  ;;  %v250_v10 = vadd.f32 %v730_v3, %v182_v8 }
  0x1a   :  { %344 = vxpose.xlu0.b32.cont [3/16] %v280_v16, 128  ;;  %v178_v16 = vmul.f32 %v725_v1, %v604_v12  ;;  %v264_v12 = vadd.f32 %v730_v3, %v196_v6 }
  0x1b   :  { %375 = vxpose.xlu1.b32.cont [2/16] %v295_v17, 128  ;;  %v314_v15 = vmax.f32 %v250_v10, 0.0  ;;  %v613_v17 = vunpack.c.h.bf16 %v683_v2 }
  0x1c   :  { %v246_v18 = vadd.f32 %v730_v3, %v178_v16 }
  0x1d   :  { %v183_v22 = vmul.f32 %v725_v1, %v613_v17 }
  0x1e   :  { %v310_v23 = vmax.f32 %v246_v18, 0.0  ;;  %v328_v18 = vmax.f32 %v264_v12, 0.0 }
  0x1f   :  { %v251_v24 = vadd.f32 %v730_v3, %v183_v22 }
  0x20   :  { %406 = vxpose.xlu2.b32.start [1/16] %v310_v23, 128 }
  0x21   :  { %v315_v28 = vmax.f32 %v251_v24, 0.0  ;;  %v686_v24 = vld [vmem:[%s1145_s0 + $0xa8] sm:$0xff]  }
  0x22   :  { %345 = vxpose.xlu0.b32.cont [4/16] %v281_v21, 128  ;;  %v569_v21 = vunpack.c.h.bf16 %v672_v5  ;;  %v327_v5 = vmax.f32 %v263_v60, 0.0 }
  0x23   :  { %376 = vxpose.xlu1.b32.cont [3/16] %v296_v31, 128 }
  0x24   :  { %v161_v27 = vmul.f32 %v725_v1, %v569_v21  ;;  %v691_v21 = vld [vmem:[%s1145_s0 + $0xd0] sm:$0xff]  }
  0x26   :  { %v229_v33 = vadd.f32 %v730_v3, %v161_v27 }
  0x28   :  { %v293_v40 = vmax.f32 %v229_v33, 0.0 }
  0x2a   :  { %346 = vxpose.xlu0.b32.cont [5/16] %v282_v25, 128  ;;  %v605_v25 = vunpack.c.h.bf16 %v681_v11  ;;  %v676_v11 = vld [vmem:[%s1145_s0 + $0x58] sm:$0xff]  }
  0x2b   :  { %377 = vxpose.xlu1.b32.cont [4/16] %v297_v44, 128  ;;  %v584_v14 = vunpack.c.l.bf16 %v676_v11  ;;  %v585_v27 = vunpack.c.h.bf16 %v676_v11 }
  0x2d   :  { %v168_v16 = vmul.f32 %v725_v1, %v584_v14 }
  0x2f   :  { %v236_v20 = vadd.f32 %v730_v3, %v168_v16 }
  0x31   :  { %v300_v23 = vmax.f32 %v236_v20, 0.0 }
  0x32   :  { %347 = vxpose.xlu0.b32.cont [6/16] %v283_v30, 128  ;;  %v179_v30 = vmul.f32 %v725_v1, %v605_v25 }
  0x33   :  { %378 = vxpose.xlu1.b32.cont [5/16] %v298_v58, 128 }
  0x34   :  { %v247_v32 = vadd.f32 %v730_v3, %v179_v30  ;;  %v684_v30 = vld [vmem:[%s1145_s0 + $0x98] sm:$0xff]  }
  0x35   :  { %v616_v31 = vunpack.c.l.bf16 %v684_v30  ;;  %v617_v44 = vunpack.c.h.bf16 %v684_v30 }
  0x36   :  { %v311_v36 = vmax.f32 %v247_v32, 0.0 }
  0x37   :  { %v184_v35 = vmul.f32 %v725_v1, %v616_v31  ;;  %v185_v49 = vmul.f32 %v725_v1, %v617_v44  ;;  %v694_v44 = vld [vmem:[%s1145_s0 + $0xe8] sm:$0xff]  }
  0x38   :  { %407 = vxpose.xlu2.b32.cont [2/16] %v311_v36, 128 }
  0x39   :  { %v252_v37 = vadd.f32 %v730_v3, %v184_v35  ;;  %v253_v51 = vadd.f32 %v730_v3, %v185_v49  ;;  %v656_v49 = vunpack.c.l.bf16 %v694_v44 }
  0x3a   :  { %348 = vxpose.xlu0.b32.cont [7/16] %v284_v34, 128  ;;  %v636_v34 = vunpack.c.l.bf16 %v689_v29  ;;  %v169_v29 = vmul.f32 %v725_v1, %v585_v27 }
  0x3b   :  { %v316_v42 = vmax.f32 %v252_v37, 0.0  ;;  %v317_v55 = vmax.f32 %v253_v51, 0.0 }
  0x3c   :  { %v194_v41 = vmul.f32 %v725_v1, %v636_v34  ;;  %v237_v34 = vadd.f32 %v730_v3, %v169_v29 }
  0x3e   :  { %v301_v36 = vmax.f32 %v237_v34, 0.0 }
  0x42   :  { %349 = vxpose.xlu0.b32.cont [8/16] %v285_v39, 128  ;;  %v608_v39 = vunpack.c.l.bf16 %v682_v38 }
  0x4a   :  { %350 = vxpose.xlu0.b32.cont [9/16] %v286_v43, 128  ;;  %v180_v43 = vmul.f32 %v725_v1, %v608_v39 }
  0x4c   :  { %v248_v45 = vadd.f32 %v730_v3, %v180_v43 }
  0x4e   :  { %v312_v50 = vmax.f32 %v248_v45, 0.0 }
  0x50   :  { %408 = vxpose.xlu2.b32.cont [3/16] %v312_v50, 128 }
  0x52   :  { %351 = vxpose.xlu0.b32.cont [10/16] %v287_v48, 128  ;;  %v262_v48 = vadd.f32 %v730_v3, %v194_v41 }
  0x54   :  { %v326_v53 = vmax.f32 %v262_v48, 0.0  ;;  %v692_v48 = vld [vmem:[%s1145_s0 + $0xd8] sm:$0xff]  }
  0x55   :  { %v649_v6 = vunpack.c.h.bf16 %v692_v48 }
  0x5a   :  { %352 = vxpose.xlu0.b32.cont [11/16] %v288_v52, 128  ;;  %v609_v52 = vunpack.c.h.bf16 %v682_v38  ;;  %v677_v38 = vld [vmem:[%s1145_s0 + $0x60] sm:$0xff]  }
  0x5b   :  { %v588_v41 = vunpack.c.l.bf16 %v677_v38  ;;  %v589_v54 = vunpack.c.h.bf16 %v677_v38 }
  0x5d   :  { %v170_v43 = vmul.f32 %v725_v1, %v588_v41 }
  0x5f   :  { %v238_v47 = vadd.f32 %v730_v3, %v170_v43 }
  0x61   :  { %v302_v50 = vmax.f32 %v238_v47, 0.0 }
  0x62   :  { %353 = vxpose.xlu0.b32.cont [12/16] %v289_v57, 128  ;;  %v181_v57 = vmul.f32 %v725_v1, %v609_v52 }
  0x64   :  { %v249_v59 = vadd.f32 %v730_v3, %v181_v57  ;;  %v685_v57 = vld [vmem:[%s1145_s0 + $0xa0] sm:$0xff]  }
  0x65   :  { %v620_v58 = vunpack.c.l.bf16 %v685_v57  ;;  %v621_v10 = vunpack.c.h.bf16 %v685_v57  ;;  %v204_v57 = vmul.f32 %v725_v1, %v656_v49 }
  0x66   :  { %v313_v63 = vmax.f32 %v249_v59, 0.0 }
  0x67   :  { %v187_v16 = vmul.f32 %v725_v1, %v621_v10 }
  0x68   :  { %409 = vxpose.xlu2.b32.cont [4/16] %v313_v63, 128  ;;  %v186_v63 = vmul.f32 %v725_v1, %v620_v58 }
  0x6a   :  { %354 = vxpose.xlu0.b32.cont [13/16] %v290_v0, 128  ;;  %v167_v0 = vmul.f32 %v725_v1, %v581_v62  ;;  %v254_v2 = vadd.f32 %v730_v3, %v186_v63  ;;  %v272_v63 = vadd.f32 %v730_v3, %v204_v57 }
  0x6c   :  { %v235_v7 = vadd.f32 %v730_v3, %v167_v0  ;;  %v318_v8 = vmax.f32 %v254_v2, 0.0 }
  0x6e   :  { %v299_v9 = vmax.f32 %v235_v7, 0.0  ;;  %v592_v7 = vunpack.c.l.bf16 %v678_v4 }
  0x70   :  { %379 = vxpose.xlu1.b32.cont [6/16] %v299_v9, 128  ;;  %410 = vxpose.xlu2.b32.cont [5/16] %v314_v15, 128  ;;  %v172_v9 = vmul.f32 %v725_v1, %v592_v7  ;;  %v693_v15 = vld [vmem:[%s1145_s0 + $0xe0] sm:$0xff]  }
  0x71   :  { %v652_v20 = vunpack.c.l.bf16 %v693_v15  ;;  %v653_v35 = vunpack.c.h.bf16 %v693_v15 }
  0x72   :  { %355 = vxpose.xlu0.b32.cont [14/16] %v291_v13, 128  ;;  %v641_v13 = vunpack.c.h.bf16 %v690_v56  ;;  %v171_v56 = vmul.f32 %v725_v1, %v589_v54  ;;  %v240_v14 = vadd.f32 %v730_v3, %v172_v9 }
  0x74   :  { %v197_v19 = vmul.f32 %v725_v1, %v641_v13  ;;  %v239_v62 = vadd.f32 %v730_v3, %v171_v56  ;;  %v201_v13 = vmul.f32 %v725_v1, %v649_v6  ;;  %v304_v17 = vmax.f32 %v240_v14, 0.0 }
  0x76   :  { %v265_v25 = vadd.f32 %v730_v3, %v197_v19  ;;  %v303_v0 = vmax.f32 %v239_v62, 0.0  ;;  %v269_v19 = vadd.f32 %v730_v3, %v201_v13  ;;  %v680_v62 = vld [vmem:[%s1145_s0 + $0x78] sm:$0xff]  }
  0x77   :  { %v600_v2 = vunpack.c.l.bf16 %v680_v62 }
  0x78   :  { %380 = vxpose.xlu1.b32.cont [7/16] %v300_v23, 128  ;;  %411 = vxpose.xlu2.b32.cont [6/16] %v315_v28, 128  ;;  %v329_v32 = vmax.f32 %v265_v25, 0.0  ;;  %v624_v25 = vunpack.c.l.bf16 %v686_v24  ;;  %v333_v27 = vmax.f32 %v269_v19, 0.0  ;;  %v202_v28 = vmul.f32 %v725_v1, %v652_v20  ;;  %v688_v20 = vld [vmem:[%s1145_s0 + $0xb8] sm:$0xff]  }
  0x7a   :  { %356 = vxpose.xlu0.b32.cont [15/16] %v292_v26, 128  ;;  %v644_v26 = vunpack.c.l.bf16 %v691_v21  ;;  %v188_v30 = vmul.f32 %v725_v1, %v624_v25  ;;  %v270_v34 = vadd.f32 %v730_v3, %v202_v28 }
  0x7c   :  { %v198_v33 = vmul.f32 %v725_v1, %v644_v26  ;;  %v334_v41 = vmax.f32 %v270_v34, 0.0 }
  0x7e   :  { %v266_v39 = vadd.f32 %v730_v3, %v198_v33  ;;  %v679_v33 = vld [vmem:[%s1145_s0 + $0x70] sm:$0xff]  }
  0x80   :  { %381 = vxpose.xlu1.b32.cont [8/16] %v301_v36, 128  ;;  %412 = vxpose.xlu2.b32.cont [7/16] %v316_v42, 128  ;;  %v330_v45 = vmax.f32 %v266_v39, 0.0  ;;  %v596_v36 = vunpack.c.l.bf16 %v679_v33  ;;  %v625_v39 = vunpack.c.h.bf16 %v686_v24  ;;  %v203_v42 = vmul.f32 %v725_v1, %v653_v35 }
  0x82   :  { %357 = vxpose.xlu0.b32.end [16/16] %v293_v40, 128  ;;  %v645_v40 = vunpack.c.h.bf16 %v691_v21  ;;  %v593_v21 = vunpack.c.h.bf16 %v678_v4  ;;  %v174_v38 = vmul.f32 %v725_v1, %v596_v36  ;;  %v696_v36 = vld [vmem:[%s1145_s0 + $0xf8] sm:$0xff]  }
  0x84   :  { %v199_v46 = vmul.f32 %v725_v1, %v645_v40  ;;  %v173_v23 = vmul.f32 %v725_v1, %v593_v21  ;;  %v242_v43 = vadd.f32 %v730_v3, %v174_v38  ;;  %v632_v21 = vunpack.c.l.bf16 %v688_v20 }
  0x86   :  { %v267_v52 = vadd.f32 %v730_v3, %v199_v46  ;;  %v241_v29 = vadd.f32 %v730_v3, %v173_v23  ;;  %v306_v46 = vmax.f32 %v242_v43, 0.0 }
  0x88   :  { %382 = vxpose.xlu1.b32.cont [9/16] %v302_v50, 128  ;;  %413 = vxpose.xlu2.b32.cont [8/16] %v317_v55, 128  ;;  %v331_v60 = vmax.f32 %v267_v52, 0.0  ;;  %v305_v31 = vmax.f32 %v241_v29, 0.0  ;;  %v597_v50 = vunpack.c.h.bf16 %v679_v33 }
  0x8a   :  { %438 = vxpose.xlu0.b32.start [1/16] %v326_v53, 128  ;;  %v648_v53 = vunpack.c.l.bf16 %v692_v48  ;;  %v271_v48 = vadd.f32 %v730_v3, %v203_v42  ;;  %v175_v52 = vmul.f32 %v725_v1, %v597_v50 }
  0x8c   :  { %v200_v61 = vmul.f32 %v725_v1, %v648_v53  ;;  %v687_v53 = vld [vmem:[%s1145_s0 + $0xb0] sm:$0xff]   ;;  %v335_v56 = vmax.f32 %v271_v48, 0.0  ;;  %v243_v58 = vadd.f32 %v730_v3, %v175_v52 }
  0x8d   :  { %v628_v54 = vunpack.c.l.bf16 %v687_v53  ;;  %v629_v6 = vunpack.c.h.bf16 %v687_v53 }
  0x90   :  { %383 = vxpose.xlu1.b32.cont [10/16] %v303_v0, 128  ;;  %414 = vxpose.xlu2.b32.cont [9/16] %v318_v8, 128  ;;  %v657_v0 = vunpack.c.h.bf16 %v694_v44  ;;  %v336_v8 = vmax.f32 %v272_v63, 0.0 }
  0x92   :  { %439 = vxpose.xlu0.b32.cont [2/16] %v327_v5, 128  ;;  %v268_v5 = vadd.f32 %v730_v3, %v200_v61  ;;  %v205_v9 = vmul.f32 %v725_v1, %v657_v0 }
  0x94   :  { %v332_v12 = vmax.f32 %v268_v5, 0.0  ;;  %v176_v5 = vmul.f32 %v725_v1, %v600_v2  ;;  %v273_v15 = vadd.f32 %v730_v3, %v205_v9 }
  0x96   :  { %v244_v10 = vadd.f32 %v730_v3, %v176_v5  ;;  %v337_v23 = vmax.f32 %v273_v15, 0.0 }
  0x98   :  { %384 = vxpose.xlu1.b32.cont [11/16] %v304_v17, 128  ;;  %v308_v13 = vmax.f32 %v244_v10, 0.0  ;;  %v601_v17 = vunpack.c.h.bf16 %v680_v62 }
  0x9a   :  { %440 = vxpose.xlu0.b32.cont [3/16] %v328_v18, 128  ;;  %v255_v18 = vadd.f32 %v730_v3, %v187_v16  ;;  %v177_v19 = vmul.f32 %v725_v1, %v601_v17 }
  0x9c   :  { %v319_v22 = vmax.f32 %v255_v18, 0.0  ;;  %v245_v25 = vadd.f32 %v730_v3, %v177_v19 }
  0x9e   :  { %415 = vxpose.xlu2.b32.cont [10/16] %v319_v22, 128 }
  0xa0   :  { %385 = vxpose.xlu1.b32.cont [12/16] %v305_v31, 128 }
  0xa2   :  { %441 = vxpose.xlu0.b32.cont [4/16] %v329_v32, 128  ;;  %v256_v32 = vadd.f32 %v730_v3, %v188_v30 }
  0xa4   :  { %v320_v37 = vmax.f32 %v256_v32, 0.0  ;;  %v633_v32 = vunpack.c.h.bf16 %v688_v20 }
  0xa6   :  { %416 = vxpose.xlu2.b32.cont [11/16] %v320_v37, 128  ;;  %v193_v37 = vmul.f32 %v725_v1, %v633_v32 }
  0xa8   :  { %386 = vxpose.xlu1.b32.cont [13/16] %v306_v46, 128  ;;  %v261_v38 = vadd.f32 %v730_v3, %v193_v37  ;;  %v665_v46 = vunpack.c.h.bf16 %v696_v36 }
  0xaa   :  { %442 = vxpose.xlu0.b32.cont [5/16] %v330_v45, 128  ;;  %v189_v45 = vmul.f32 %v725_v1, %v625_v39  ;;  %v209_v49 = vmul.f32 %v725_v1, %v665_v46 }
  0xac   :  { %v257_v47 = vadd.f32 %v730_v3, %v189_v45  ;;  %v277_v50 = vadd.f32 %v730_v3, %v209_v49 }
  0xae   :  { %v358_v59 = vpop.trf.xlu0  ;;  %v321_v51 = vmax.f32 %v257_v47, 0.0  ;;  %v341_v52 = vmax.f32 %v277_v50, 0.0 }
  0xaf   :  { %470 = vst [vmem:[%s1148_s3] sm:$0xff] %v358_v59  ;;  %v190_v59 = vmul.f32 %v725_v1, %v628_v54 }
  0xb0   :  { %417 = vxpose.xlu2.b32.cont [12/16] %v321_v51, 128 }
  0xb1   :  { %v258_v61 = vadd.f32 %v730_v3, %v190_v59 }
  0xb2   :  { %443 = vxpose.xlu0.b32.cont [6/16] %v331_v60, 128  ;;  %v307_v60 = vmax.f32 %v243_v58, 0.0 }
  0xb3   :  { %v322_v4 = vmax.f32 %v258_v61, 0.0 }
  0xb4   :  { %387 = vxpose.xlu1.b32.cont [14/16] %v307_v60, 128 }
  0xb6   :  { %v359_v11 = vpop.trf.xlu0 }
  0xb7   :  { %474 = vst [vmem:[%s1148_s3 + $0x20] sm:$0xff] %v359_v11  ;;  %v695_v11 = vld [vmem:[%s1145_s0 + $0xf0] sm:$0xff]  }
  0xb8   :  { %418 = vxpose.xlu2.b32.cont [13/16] %v322_v4, 128  ;;  %v660_v16 = vunpack.c.l.bf16 %v695_v11  ;;  %v661_v30 = vunpack.c.h.bf16 %v695_v11 }
  0xba   :  { %444 = vxpose.xlu0.b32.cont [7/16] %v332_v12, 128  ;;  %v191_v12 = vmul.f32 %v725_v1, %v629_v6  ;;  %v206_v24 = vmul.f32 %v725_v1, %v660_v16  ;;  %v207_v35 = vmul.f32 %v725_v1, %v661_v30 }
  0xbc   :  { %v259_v14 = vadd.f32 %v730_v3, %v191_v12  ;;  %388 = vxpose.xlu1.b32.cont [15/16] %v308_v13, 128  ;;  %v274_v29 = vadd.f32 %v730_v3, %v206_v24  ;;  %v275_v39 = vadd.f32 %v730_v3, %v207_v35 }
  0xbe   :  { %v360_v26 = vpop.trf.xlu0  ;;  %v323_v18 = vmax.f32 %v259_v14, 0.0  ;;  %v338_v34 = vmax.f32 %v274_v29, 0.0  ;;  %v339_v43 = vmax.f32 %v275_v39, 0.0 }
  0xbf   :  { %478 = vst [vmem:[%s1148_s3 + $0x40] sm:$0xff] %v360_v26  ;;  %v192_v26 = vmul.f32 %v725_v1, %v632_v21 }
  0xc0   :  { %419 = vxpose.xlu2.b32.cont [14/16] %v323_v18, 128 }
  0xc1   :  { %v260_v28 = vadd.f32 %v730_v3, %v192_v26 }
  0xc2   :  { %445 = vxpose.xlu0.b32.cont [8/16] %v333_v27, 128  ;;  %v309_v27 = vmax.f32 %v245_v25, 0.0 }
  0xc3   :  { %v324_v31 = vmax.f32 %v260_v28, 0.0 }
  0xc4   :  { %389 = vxpose.xlu1.b32.end [16/16] %v309_v27, 128 }
  0xc6   :  { %v361_v40 = vpop.trf.xlu0 }
  0xc7   :  { %482 = vst [vmem:[%s1148_s3 + $0x60] sm:$0xff] %v361_v40  ;;  %v664_v40 = vunpack.c.l.bf16 %v696_v36 }
  0xc8   :  { %420 = vxpose.xlu2.b32.cont [15/16] %v324_v31, 128 }
  0xc9   :  { %v208_v44 = vmul.f32 %v725_v1, %v664_v40 }
  0xca   :  { %446 = vxpose.xlu0.b32.cont [9/16] %v334_v41, 128  ;;  %v325_v41 = vmax.f32 %v261_v38, 0.0 }
  0xcb   :  { %v276_v45 = vadd.f32 %v730_v3, %v208_v44 }
  0xcd   :  { %v340_v48 = vmax.f32 %v276_v45, 0.0 }
  0xce   :  { %v362_v55 = vpop.trf.xlu0 }
  0xcf   :  { %486 = vst [vmem:[%s1148_s3 + $0x80] sm:$0xff] %v362_v55 }
  0xd0   :  { %421 = vxpose.xlu2.b32.end [16/16] %v325_v41, 128 }
  0xd2   :  { %447 = vxpose.xlu0.b32.cont [10/16] %v335_v56, 128 }
  0xd6   :  { %v363_v7 = vpop.trf.xlu0 }
  0xd7   :  { %490 = vst [vmem:[%s1148_s3 + $0xa0] sm:$0xff] %v363_v7 }
  0xda   :  { %448 = vxpose.xlu0.b32.cont [11/16] %v336_v8, 128 }
  0xde   :  { %v364_v22 = vpop.trf.xlu0 }
  0xdf   :  { %494 = vst [vmem:[%s1148_s3 + $0xc0] sm:$0xff] %v364_v22 }
  0xe2   :  { %449 = vxpose.xlu0.b32.cont [12/16] %v337_v23, 128 }
  0xe6   :  { %v365_v33 = vpop.trf.xlu0 }
  0xe7   :  { %498 = vst [vmem:[%s1148_s3 + $0xe0] sm:$0xff] %v365_v33 }
  0xea   :  { %450 = vxpose.xlu0.b32.cont [13/16] %v338_v34, 128 }
  0xee   :  { %v366_v42 = vpop.trf.xlu0 }
  0xef   :  { %502 = vst [vmem:[%s1148_s3 + $0x100] sm:$0xff] %v366_v42 }
  0xf0   :  { %v390_v55 = vpop.trf.xlu1 }
  0xf1   :  { %v422_v54 = vpop.trf.xlu2  ;;  %471 = vst [vmem:[%s1148_s3 + $0x8] sm:$0xff] %v390_v55 }
  0xf2   :  { %451 = vxpose.xlu0.b32.cont [14/16] %v339_v43, 128  ;;  %472 = vst [vmem:[%s1148_s3 + $0x10] sm:$0xff] %v422_v54 }
  0xf6   :  { %v367_v47 = vpop.trf.xlu0 }
  0xf7   :  { %506 = vst [vmem:[%s1148_s3 + $0x120] sm:$0xff] %v367_v47 }
  0xf8   :  { %v391_v57 = vpop.trf.xlu1 }
  0xf9   :  { %v423_v56 = vpop.trf.xlu2  ;;  %475 = vst [vmem:[%s1148_s3 + $0x28] sm:$0xff] %v391_v57 }
  0xfa   :  { %452 = vxpose.xlu0.b32.cont [15/16] %v340_v48, 128  ;;  %476 = vst [vmem:[%s1148_s3 + $0x30] sm:$0xff] %v423_v56 }
  0xfe   :  { %v368_v51 = vpop.trf.xlu0 }
  0xff   :  { %510 = vst [vmem:[%s1148_s3 + $0x140] sm:$0xff] %v368_v51 }
 0x100   :  { %v392_v60 = vpop.trf.xlu1 }
 0x101   :  { %v424_v59 = vpop.trf.xlu2  ;;  %479 = vst [vmem:[%s1148_s3 + $0x48] sm:$0xff] %v392_v60 }
 0x102   :  { %453 = vxpose.xlu0.b32.end [16/16] %v341_v52, 128  ;;  %480 = vst [vmem:[%s1148_s3 + $0x50] sm:$0xff] %v424_v59 }
 0x106   :  { %v369_v53 = vpop.trf.xlu0 }
 0x107   :  { %514 = vst [vmem:[%s1148_s3 + $0x160] sm:$0xff] %v369_v53 }
 0x108   :  { %v393_v63 = vpop.trf.xlu1 }
 0x109   :  { %v425_v62 = vpop.trf.xlu2  ;;  %483 = vst [vmem:[%s1148_s3 + $0x68] sm:$0xff] %v393_v63 }
 0x10a   :  { %484 = vst [vmem:[%s1148_s3 + $0x70] sm:$0xff] %v425_v62 }
 0x10e   :  { %v370_v1 = vpop.trf.xlu0 }
 0x10f   :  { %518 = vst [vmem:[%s1148_s3 + $0x180] sm:$0xff] %v370_v1 }
 0x110   :  { %v394_v4 = vpop.trf.xlu1 }
 0x111   :  { %v426_v2 = vpop.trf.xlu2  ;;  %487 = vst [vmem:[%s1148_s3 + $0x88] sm:$0xff] %v394_v4 }
 0x112   :  { %488 = vst [vmem:[%s1148_s3 + $0x90] sm:$0xff] %v426_v2 }
 0x116   :  { %v371_v3 = vpop.trf.xlu0 }
 0x117   :  { %522 = vst [vmem:[%s1148_s3 + $0x1a0] sm:$0xff] %v371_v3 }
 0x118   :  { %v395_v7 = vpop.trf.xlu1 }
 0x119   :  { %v427_v6 = vpop.trf.xlu2  ;;  %491 = vst [vmem:[%s1148_s3 + $0xa8] sm:$0xff] %v395_v7 }
 0x11a   :  { %492 = vst [vmem:[%s1148_s3 + $0xb0] sm:$0xff] %v427_v6 }
 0x11e   :  { %v372_v58 = vpop.trf.xlu0 }
 0x11f   :  { %526 = vst [vmem:[%s1148_s3 + $0x1c0] sm:$0xff] %v372_v58 }
 0x120   :  { %v396_v10 = vpop.trf.xlu1 }
 0x121   :  { %v428_v9 = vpop.trf.xlu2  ;;  %495 = vst [vmem:[%s1148_s3 + $0xc8] sm:$0xff] %v396_v10 }
 0x122   :  { %496 = vst [vmem:[%s1148_s3 + $0xd0] sm:$0xff] %v428_v9 }
 0x126   :  { %v373_v61 = vpop.trf.xlu0 }
 0x127   :  { %530 = vst [vmem:[%s1148_s3 + $0x1e0] sm:$0xff] %v373_v61 }
 0x128   :  { %v397_v13 = vpop.trf.xlu1 }
 0x129   :  { %v429_v12 = vpop.trf.xlu2  ;;  %499 = vst [vmem:[%s1148_s3 + $0xe8] sm:$0xff] %v397_v13 }
 0x12a   :  { %500 = vst [vmem:[%s1148_s3 + $0xf0] sm:$0xff] %v429_v12 }
 0x12e   :  { %v454_v0 = vpop.trf.xlu0 }
 0x12f   :  { %473 = vst [vmem:[%s1148_s3 + $0x18] sm:$0xff] %v454_v0 }
 0x130   :  { %v398_v16 = vpop.trf.xlu1 }
 0x131   :  { %v430_v15 = vpop.trf.xlu2  ;;  %503 = vst [vmem:[%s1148_s3 + $0x108] sm:$0xff] %v398_v16 }
 0x132   :  { %504 = vst [vmem:[%s1148_s3 + $0x110] sm:$0xff] %v430_v15 }
 0x136   :  { %v455_v5 = vpop.trf.xlu0 }
 0x137   :  { %477 = vst [vmem:[%s1148_s3 + $0x38] sm:$0xff] %v455_v5 }
 0x138   :  { %v399_v19 = vpop.trf.xlu1 }
 0x139   :  { %v431_v18 = vpop.trf.xlu2  ;;  %507 = vst [vmem:[%s1148_s3 + $0x128] sm:$0xff] %v399_v19 }
 0x13a   :  { %508 = vst [vmem:[%s1148_s3 + $0x130] sm:$0xff] %v431_v18 }
 0x13e   :  { %v456_v8 = vpop.trf.xlu0 }
 0x13f   :  { %481 = vst [vmem:[%s1148_s3 + $0x58] sm:$0xff] %v456_v8 }
 0x140   :  { %v400_v22 = vpop.trf.xlu1 }
 0x141   :  { %v432_v21 = vpop.trf.xlu2  ;;  %511 = vst [vmem:[%s1148_s3 + $0x148] sm:$0xff] %v400_v22 }
 0x142   :  { %512 = vst [vmem:[%s1148_s3 + $0x150] sm:$0xff] %v432_v21 }
 0x146   :  { %v457_v11 = vpop.trf.xlu0 }
 0x147   :  { %485 = vst [vmem:[%s1148_s3 + $0x78] sm:$0xff] %v457_v11 }
 0x148   :  { %v401_v25 = vpop.trf.xlu1 }
 0x149   :  { %v433_v24 = vpop.trf.xlu2  ;;  %515 = vst [vmem:[%s1148_s3 + $0x168] sm:$0xff] %v401_v25 }
 0x14a   :  { %516 = vst [vmem:[%s1148_s3 + $0x170] sm:$0xff] %v433_v24 }
 0x14e   :  { %v458_v14 = vpop.trf.xlu0 }
 0x14f   :  { %489 = vst [vmem:[%s1148_s3 + $0x98] sm:$0xff] %v458_v14 }
 0x150   :  { %v402_v28 = vpop.trf.xlu1 }
 0x151   :  { %v434_v27 = vpop.trf.xlu2  ;;  %519 = vst [vmem:[%s1148_s3 + $0x188] sm:$0xff] %v402_v28 }
 0x152   :  { %520 = vst [vmem:[%s1148_s3 + $0x190] sm:$0xff] %v434_v27 }
 0x156   :  { %v459_v17 = vpop.trf.xlu0 }
 0x157   :  { %493 = vst [vmem:[%s1148_s3 + $0xb8] sm:$0xff] %v459_v17 }
 0x158   :  { %v403_v31 = vpop.trf.xlu1 }
 0x159   :  { %v435_v30 = vpop.trf.xlu2  ;;  %523 = vst [vmem:[%s1148_s3 + $0x1a8] sm:$0xff] %v403_v31 }
 0x15a   :  { %524 = vst [vmem:[%s1148_s3 + $0x1b0] sm:$0xff] %v435_v30 }
 0x15e   :  { %v460_v20 = vpop.trf.xlu0 }
 0x15f   :  { %497 = vst [vmem:[%s1148_s3 + $0xd8] sm:$0xff] %v460_v20 }
 0x160   :  { %v404_v34 = vpop.trf.xlu1 }
 0x161   :  { %v436_v33 = vpop.trf.xlu2  ;;  %527 = vst [vmem:[%s1148_s3 + $0x1c8] sm:$0xff] %v404_v34 }
 0x162   :  { %528 = vst [vmem:[%s1148_s3 + $0x1d0] sm:$0xff] %v436_v33 }
 0x166   :  { %v461_v23 = vpop.trf.xlu0 }
 0x167   :  { %501 = vst [vmem:[%s1148_s3 + $0xf8] sm:$0xff] %v461_v23 }
 0x168   :  { %v405_v37 = vpop.trf.xlu1 }
 0x169   :  { %v437_v36 = vpop.trf.xlu2  ;;  %531 = vst [vmem:[%s1148_s3 + $0x1e8] sm:$0xff] %v405_v37 }
 0x16a   :  { %532 = vst [vmem:[%s1148_s3 + $0x1f0] sm:$0xff] %v437_v36 }
 0x16e   :  { %v462_v26 = vpop.trf.xlu0 }
 0x16f   :  { %505 = vst [vmem:[%s1148_s3 + $0x118] sm:$0xff] %v462_v26 }
 0x176   :  { %v463_v29 = vpop.trf.xlu0 }
 0x177   :  { %509 = vst [vmem:[%s1148_s3 + $0x138] sm:$0xff] %v463_v29 }
 0x17e   :  { %v464_v32 = vpop.trf.xlu0 }
 0x17f   :  { %513 = vst [vmem:[%s1148_s3 + $0x158] sm:$0xff] %v464_v32 }
 0x186   :  { %v465_v35 = vpop.trf.xlu0 }
 0x187   :  { %517 = vst [vmem:[%s1148_s3 + $0x178] sm:$0xff] %v465_v35 }
 0x18e   :  { %v466_v38 = vpop.trf.xlu0 }
 0x18f   :  { %521 = vst [vmem:[%s1148_s3 + $0x198] sm:$0xff] %v466_v38 }
 0x196   :  { %v467_v39 = vpop.trf.xlu0 }
 0x197   :  { %525 = vst [vmem:[%s1148_s3 + $0x1b8] sm:$0xff] %v467_v39 }
 0x19e   :  { %v468_v40 = vpop.trf.xlu0 }
 0x19f   :  { %529 = vst [vmem:[%s1148_s3 + $0x1d8] sm:$0xff] %v468_v40 }
 0x1a6   :  { %v469_v41 = vpop.trf.xlu0 }
 0x1a7   :  { %533 = vst [vmem:[%s1148_s3 + $0x1f8] sm:$0xff] %v469_v41 }

// kernel: basic_conv_forward.2
= control target key start
LH: loop header
LB: loop body
LE: loop exit
PB: predicated region body
PF: predicated region fallthrough
CT: control target
= control target key end

     0   :  { %s2124_s1 = inlined_call_operand.vmem [shape: bf16[128,128], index: 1, kind: input, shape index: {}]   ;;  %s2125_s0 = inlined_call_operand.vmem [shape: bf16[512,128], index: 0, kind: input, shape index: {}]   ;;  %s2126_s2 = inlined_call_operand.vmem [shape: bf16[512,128], index: 2, kind: output, shape index: {0}]   ;;  %s2127_s3 = inlined_call_operand.vmem [shape: f32[1,1,128], index: 3, kind: output, shape index: {1}]   ;;  %s2128_s4 = inlined_call_operand.vmem [shape: f32[1,1,128], index: 4, kind: output, shape index: {2}]  }
   0x1   :  { %v1373_v0 = vld [vmem:[%s2124_s1 + $0x38] sm:$0xff]  ;;  %v1372_v1 = vld [vmem:[%s2124_s1 + $0x30] sm:$0xff]  ;;  %v1371_v2 = vld [vmem:[%s2124_s1 + $0x28] sm:$0xff] }
   0x2   :  { %466 = vmatpush.bf16.msra.mxu0 %v1373_v0  ;;  %1565 = vmatpush.bf16.msra.mxu1 %v1373_v0  ;;  %v1370_v3 = vld [vmem:[%s2124_s1 + $0x20] sm:$0xff]  ;;  %v1369_v4 = vld [vmem:[%s2124_s1 + $0x18] sm:$0xff]  ;;  %v1368_v5 = vld [vmem:[%s2124_s1 + $0x10] sm:$0xff] }
   0x3   :  { %1566 = vmatpush.bf16.msra.mxu2 %v1373_v0  ;;  %1567 = vmatpush.bf16.msra.mxu3 %v1373_v0  ;;  %v1367_v6 = vld [vmem:[%s2124_s1 + $0x8] sm:$0xff]  ;;  %v1366_v7 = vld [vmem:[%s2124_s1] sm:$0xff]  ;;  %v1336_v13 = vld [vmem:[%s2125_s0 + $0x10] sm:$0xff] }
   0x4   :  { %v1334_v8 = vld [vmem:[%s2125_s0] sm:$0xff]  ;;  %v1335_v10 = vld [vmem:[%s2125_s0 + $0x8] sm:$0xff]  ;;  %v1344_v14 = vld [vmem:[%s2125_s0 + $0x50] sm:$0xff] }
   0x5   :  { %v1342_v9 = vld [vmem:[%s2125_s0 + $0x40] sm:$0xff]  ;;  %v1343_v11 = vld [vmem:[%s2125_s0 + $0x48] sm:$0xff]  ;;  %v1337_v16 = vld [vmem:[%s2125_s0 + $0x18] sm:$0xff] }
   0x6   :  { %467 = vmatpush.bf16.msra.mxu0 %v1372_v1  ;;  %1568 = vmatpush.bf16.msra.mxu1 %v1372_v1  ;;  %v1350_v12 = vld [vmem:[%s2125_s0 + $0x80] sm:$0xff]  ;;  %v1351_v15 = vld [vmem:[%s2125_s0 + $0x88] sm:$0xff]  ;;  %v1345_v17 = vld [vmem:[%s2125_s0 + $0x58] sm:$0xff] }
   0x7   :  { %1569 = vmatpush.bf16.msra.mxu2 %v1372_v1  ;;  %1570 = vmatpush.bf16.msra.mxu3 %v1372_v1  ;;  %v1352_v18 = vld [vmem:[%s2125_s0 + $0x90] sm:$0xff]  ;;  %v1358_v19 = vld [vmem:[%s2125_s0 + $0xc0] sm:$0xff]  ;;  %v1353_v22 = vld [vmem:[%s2125_s0 + $0x98] sm:$0xff] }
   0x8   :  { %v1338_v20 = vld [vmem:[%s2125_s0 + $0x20] sm:$0xff]  ;;  %v1359_v23 = vld [vmem:[%s2125_s0 + $0xc8] sm:$0xff]  ;;  %v1360_v27 = vld [vmem:[%s2125_s0 + $0xd0] sm:$0xff] }
   0x9   :  { %v1346_v21 = vld [vmem:[%s2125_s0 + $0x60] sm:$0xff]  ;;  %v1339_v24 = vld [vmem:[%s2125_s0 + $0x28] sm:$0xff]  ;;  %v1340_v28 = vld [vmem:[%s2125_s0 + $0x30] sm:$0xff] }
   0xa   :  { %468 = vmatpush.bf16.msra.mxu0 %v1371_v2  ;;  %1571 = vmatpush.bf16.msra.mxu1 %v1371_v2  ;;  %v1347_v25 = vld [vmem:[%s2125_s0 + $0x68] sm:$0xff]  ;;  %v1354_v26 = vld [vmem:[%s2125_s0 + $0xa0] sm:$0xff]  ;;  %v1348_v29 = vld [vmem:[%s2125_s0 + $0x70] sm:$0xff] }
   0xb   :  { %1572 = vmatpush.bf16.msra.mxu2 %v1371_v2  ;;  %1573 = vmatpush.bf16.msra.mxu3 %v1371_v2  ;;  %v1355_v30 = vld [vmem:[%s2125_s0 + $0xa8] sm:$0xff]  ;;  %v1361_v31 = vld [vmem:[%s2125_s0 + $0xd8] sm:$0xff]  ;;  %v1356_v34 = vld [vmem:[%s2125_s0 + $0xb0] sm:$0xff] }
   0xc   :  { %v1341_v32 = vld [vmem:[%s2125_s0 + $0x38] sm:$0xff]  ;;  %v1362_v35 = vld [vmem:[%s2125_s0 + $0xe0] sm:$0xff]  ;;  %v1363_v39 = vld [vmem:[%s2125_s0 + $0xe8] sm:$0xff] }
   0xd   :  { %v1349_v33 = vld [vmem:[%s2125_s0 + $0x78] sm:$0xff]  ;;  %v1364_v53 = vld [vmem:[%s2125_s0 + $0xf0] sm:$0xff] }
   0xe   :  { %469 = vmatpush.bf16.msra.mxu0 %v1370_v3  ;;  %1574 = vmatpush.bf16.msra.mxu1 %v1370_v3  ;;  %v1357_v38 = vld [vmem:[%s2125_s0 + $0xb8] sm:$0xff] }
   0xf   :  { %1575 = vmatpush.bf16.msra.mxu2 %v1370_v3  ;;  %1576 = vmatpush.bf16.msra.mxu3 %v1370_v3 }
  0x12   :  { %470 = vmatpush.bf16.msra.mxu0 %v1369_v4  ;;  %1577 = vmatpush.bf16.msra.mxu1 %v1369_v4 }
  0x13   :  { %1578 = vmatpush.bf16.msra.mxu2 %v1369_v4  ;;  %1579 = vmatpush.bf16.msra.mxu3 %v1369_v4 }
  0x16   :  { %471 = vmatpush.bf16.msra.mxu0 %v1368_v5  ;;  %1580 = vmatpush.bf16.msra.mxu1 %v1368_v5 }
  0x17   :  { %1581 = vmatpush.bf16.msra.mxu2 %v1368_v5  ;;  %1582 = vmatpush.bf16.msra.mxu3 %v1368_v5  ;;  %v1365_v5 = vld [vmem:[%s2125_s0 + $0xf8] sm:$0xff] }
  0x1a   :  { %472 = vmatpush.bf16.msra.mxu0 %v1367_v6  ;;  %1583 = vmatpush.bf16.msra.mxu1 %v1367_v6 }
  0x1b   :  { %1584 = vmatpush.bf16.msra.mxu2 %v1367_v6  ;;  %1585 = vmatpush.bf16.msra.mxu3 %v1367_v6 }
  0x1e   :  { %473 = vmatpush.bf16.msra.mxu0 %v1366_v7  ;;  %1586 = vmatpush.bf16.msra.mxu1 %v1366_v7 }
  0x1f   :  { %1587 = vmatpush.bf16.msra.mxu2 %v1366_v7  ;;  %1588 = vmatpush.bf16.msra.mxu3 %v1366_v7 }
  0x21   :  { %474 = vmatmul.bf16.vlgmr.msra.gmra.mxu0 %v1334_v8  ;;  %514 = vmatmul.bf16.vlgmr.msra.gmra.mxu1 %v1342_v9 }
  0x22   :  { %554 = vmatmul.bf16.vlgmr.msra.gmra.mxu2 %v1350_v12  ;;  %594 = vmatmul.bf16.vlgmr.msra.gmra.mxu3 %v1358_v19 }
  0x31   :  { %479 = vmatmul.bf16.gmra.mxu0 %v1335_v10  ;;  %519 = vmatmul.bf16.gmra.mxu1 %v1343_v11 }
  0x32   :  { %559 = vmatmul.bf16.gmra.mxu2 %v1351_v15  ;;  %599 = vmatmul.bf16.gmra.mxu3 %v1359_v23 }
  0x41   :  { %484 = vmatmul.bf16.gmra.mxu0 %v1336_v13  ;;  %524 = vmatmul.bf16.gmra.mxu1 %v1344_v14 }
  0x42   :  { %564 = vmatmul.bf16.gmra.mxu2 %v1352_v18  ;;  %604 = vmatmul.bf16.gmra.mxu3 %v1360_v27 }
  0x51   :  { %489 = vmatmul.bf16.gmra.mxu0 %v1337_v16  ;;  %529 = vmatmul.bf16.gmra.mxu1 %v1345_v17 }
  0x52   :  { %569 = vmatmul.bf16.gmra.mxu2 %v1353_v22  ;;  %609 = vmatmul.bf16.gmra.mxu3 %v1361_v31 }
  0x61   :  { %494 = vmatmul.bf16.gmra.mxu0 %v1338_v20  ;;  %534 = vmatmul.bf16.gmra.mxu1 %v1346_v21 }
  0x62   :  { %574 = vmatmul.bf16.gmra.mxu2 %v1354_v26  ;;  %614 = vmatmul.bf16.gmra.mxu3 %v1362_v35 }
  0x71   :  { %499 = vmatmul.bf16.gmra.mxu0 %v1339_v24  ;;  %539 = vmatmul.bf16.gmra.mxu1 %v1347_v25 }
  0x72   :  { %579 = vmatmul.bf16.gmra.mxu2 %v1355_v30  ;;  %619 = vmatmul.bf16.gmra.mxu3 %v1363_v39 }
  0x81   :  { %504 = vmatmul.bf16.gmra.mxu0 %v1340_v28  ;;  %544 = vmatmul.bf16.gmra.mxu1 %v1348_v29 }
  0x82   :  { %584 = vmatmul.bf16.gmra.mxu2 %v1356_v34  ;;  %624 = vmatmul.bf16.gmra.mxu3 %v1364_v53 }
  0x91   :  { %509 = vmatmul.bf16.gmra.mxu0 %v1341_v32  ;;  %549 = vmatmul.bf16.gmra.mxu1 %v1349_v33 }
  0x92   :  { %589 = vmatmul.bf16.gmra.mxu2 %v1357_v38  ;;  %629 = vmatmul.bf16.gmra.mxu3 %v1365_v5 }
  0x9e   :  { %v475_v36 = vpop.f32.mrf.mxu0  ;;  %v1722_v37 = vpop.f32.mrf.mxu1 }
  0x9f   :  { %v1028_v40 = vmul.f32 %v475_v36, %v475_v36 }
  0xa5   :  { %v1749_v60 = vpop.f32.mrf.mxu2  ;;  %v1800_v20 = vpop.f32.mrf.mxu3 }
  0xa6   :  { %v477_v41 = vpop.f32.mrf.mxu0  ;;  %v1730_v42 = vpop.f32.mrf.mxu1 }
  0xa7   :  { %v1377_v43 = vpack.c.bf16 %v477_v41, %v475_v36  ;;  %v958_v44 = vadd.f32 %v477_v41, %v475_v36  ;;  %v1029_v45 = vmul.f32 %v477_v41, %v477_v41  ;;  %v1417_v46 = vpack.c.bf16 %v1730_v42, %v1722_v37 }
  0xa9   :  { %1378 = vst [vmem:[%s2126_s2] sm:$0xff] %v1377_v43   ;;  %v1092_v47 = vadd.f32 %v1029_v45, %v1028_v40 }
  0xaa   :  { %1541 = vst [vmem:[%s2126_s2 + $0x40] sm:$0xff] %v1417_v46  }
  0xad   :  { %v1761_v2 = vpop.f32.mrf.mxu2  ;;  %v1812_v24 = vpop.f32.mrf.mxu3 }
  0xae   :  { %v480_v48 = vpop.f32.mrf.mxu0  ;;  %v1740_v49 = vpop.f32.mrf.mxu1  ;;  %v1457_v3 = vpack.c.bf16 %v1761_v2, %v1749_v60  ;;  %v1497_v26 = vpack.c.bf16 %v1812_v24, %v1800_v20 }
  0xaf   :  { %v959_v50 = vadd.f32 %v958_v44, %v480_v48  ;;  %v1030_v51 = vmul.f32 %v480_v48, %v480_v48 }
  0xb0   :  { %1549 = vst [vmem:[%s2126_s2 + $0x80] sm:$0xff] %v1457_v3  }
  0xb1   :  { %v1093_v52 = vadd.f32 %v1092_v47, %v1030_v51  ;;  %1557 = vst [vmem:[%s2126_s2 + $0xc0] sm:$0xff] %v1497_v26  }
  0xb5   :  { %v1777_v10 = vpop.f32.mrf.mxu2  ;;  %v1830_v32 = vpop.f32.mrf.mxu3 }
  0xb6   :  { %v482_v54 = vpop.f32.mrf.mxu0  ;;  %v1745_v55 = vpop.f32.mrf.mxu1 }
  0xb7   :  { %v1382_v56 = vpack.c.bf16 %v482_v54, %v480_v48  ;;  %v960_v57 = vadd.f32 %v959_v50, %v482_v54  ;;  %v1031_v58 = vmul.f32 %v482_v54, %v482_v54  ;;  %v1422_v59 = vpack.c.bf16 %v1745_v55, %v1740_v49 }
  0xb9   :  { %1534 = vst [vmem:[%s2126_s2 + $0x8] sm:$0xff] %v1382_v56   ;;  %v1094_v61 = vadd.f32 %v1093_v52, %v1031_v58 }
  0xba   :  { %1542 = vst [vmem:[%s2126_s2 + $0x48] sm:$0xff] %v1422_v59  }
  0xbd   :  { %v1787_v13 = vpop.f32.mrf.mxu2  ;;  %v1842_v36 = vpop.f32.mrf.mxu3 }
  0xbe   :  { %v485_v62 = vpop.f32.mrf.mxu0  ;;  %v1757_v63 = vpop.f32.mrf.mxu1  ;;  %v1462_v14 = vpack.c.bf16 %v1787_v13, %v1777_v10  ;;  %v1502_v39 = vpack.c.bf16 %v1842_v36, %v1830_v32 }
  0xbf   :  { %v1759_v0 = vadd.f32 %v960_v57, %v485_v62  ;;  %v1032_v1 = vmul.f32 %v485_v62, %v485_v62 }
  0xc0   :  { %1550 = vst [vmem:[%s2126_s2 + $0x88] sm:$0xff] %v1462_v14  }
  0xc1   :  { %v1765_v4 = vadd.f32 %v1094_v61, %v1032_v1  ;;  %1558 = vst [vmem:[%s2126_s2 + $0xc8] sm:$0xff] %v1502_v39  }
  0xc5   :  { %v1798_v19 = vpop.f32.mrf.mxu2  ;;  %v1860_v46 = vpop.f32.mrf.mxu3 }
  0xc6   :  { %v487_v6 = vpop.f32.mrf.mxu0  ;;  %v1773_v7 = vpop.f32.mrf.mxu1 }
  0xc7   :  { %v1387_v8 = vpack.c.bf16 %v487_v6, %v485_v62  ;;  %v1427_v9 = vpack.c.bf16 %v1773_v7, %v1757_v63  ;;  %v1033_v52 = vmul.f32 %v487_v6, %v487_v6  ;;  %v962_v57 = vadd.f32 %v1759_v0, %v487_v6 }
  0xc9   :  { %1535 = vst [vmem:[%s2126_s2 + $0x10] sm:$0xff] %v1387_v8   ;;  %v1096_v58 = vadd.f32 %v1765_v4, %v1033_v52 }
  0xca   :  { %1543 = vst [vmem:[%s2126_s2 + $0x50] sm:$0xff] %v1427_v9  }
  0xcd   :  { %v1810_v23 = vpop.f32.mrf.mxu2  ;;  %v1872_v51 = vpop.f32.mrf.mxu3 }
  0xce   :  { %v490_v11 = vpop.f32.mrf.mxu0  ;;  %v1785_v12 = vpop.f32.mrf.mxu1  ;;  %v1467_v25 = vpack.c.bf16 %v1810_v23, %v1798_v19  ;;  %v1507_v54 = vpack.c.bf16 %v1872_v51, %v1860_v46 }
  0xcf   :  { %v1034_v56 = vmul.f32 %v490_v11, %v490_v11  ;;  %v963_v61 = vadd.f32 %v962_v57, %v490_v11 }
  0xd0   :  { %1551 = vst [vmem:[%s2126_s2 + $0x90] sm:$0xff] %v1467_v25  }
  0xd1   :  { %1559 = vst [vmem:[%s2126_s2 + $0xd0] sm:$0xff] %v1507_v54   ;;  %v1097_v62 = vadd.f32 %v1096_v58, %v1034_v56 }
  0xd5   :  { %v1828_v31 = vpop.f32.mrf.mxu2  ;;  %v1892_v0 = vpop.f32.mrf.mxu3 }
  0xd6   :  { %v492_v15 = vpop.f32.mrf.mxu0  ;;  %v1794_v16 = vpop.f32.mrf.mxu1 }
  0xd7   :  { %v1392_v17 = vpack.c.bf16 %v492_v15, %v490_v11  ;;  %v1432_v18 = vpack.c.bf16 %v1794_v16, %v1785_v12  ;;  %v1035_v59 = vmul.f32 %v492_v15, %v492_v15  ;;  %v964_v8 = vadd.f32 %v963_v61, %v492_v15 }
  0xd9   :  { %1536 = vst [vmem:[%s2126_s2 + $0x18] sm:$0xff] %v1392_v17   ;;  %v1098_v6 = vadd.f32 %v1097_v62, %v1035_v59 }
  0xda   :  { %1544 = vst [vmem:[%s2126_s2 + $0x58] sm:$0xff] %v1432_v18  }
  0xdd   :  { %v1840_v35 = vpop.f32.mrf.mxu2 }
  0xde   :  { %v495_v21 = vpop.f32.mrf.mxu0  ;;  %v1808_v22 = vpop.f32.mrf.mxu1  ;;  %v1472_v38 = vpack.c.bf16 %v1840_v35, %v1828_v31 }
  0xdf   :  { %v1036_v1 = vmul.f32 %v495_v21, %v495_v21  ;;  %v965_v25 = vadd.f32 %v964_v8, %v495_v21 }
  0xe0   :  { %1552 = vst [vmem:[%s2126_s2 + $0x98] sm:$0xff] %v1472_v38  }
  0xe1   :  { %v1099_v4 = vadd.f32 %v1098_v6, %v1036_v1 }
  0xe5   :  { %v1858_v45 = vpop.f32.mrf.mxu2 }
  0xe6   :  { %v497_v27 = vpop.f32.mrf.mxu0  ;;  %v1824_v28 = vpop.f32.mrf.mxu1 }
  0xe7   :  { %v1397_v29 = vpack.c.bf16 %v497_v27, %v495_v21  ;;  %v1437_v30 = vpack.c.bf16 %v1824_v28, %v1808_v22  ;;  %v1037_v18 = vmul.f32 %v497_v27, %v497_v27  ;;  %v966_v15 = vadd.f32 %v965_v25, %v497_v27 }
  0xe9   :  { %1537 = vst [vmem:[%s2126_s2 + $0x20] sm:$0xff] %v1397_v29   ;;  %v1100_v26 = vadd.f32 %v1099_v4, %v1037_v18 }
  0xea   :  { %1545 = vst [vmem:[%s2126_s2 + $0x60] sm:$0xff] %v1437_v30  }
  0xed   :  { %v1870_v50 = vpop.f32.mrf.mxu2 }
  0xee   :  { %v500_v33 = vpop.f32.mrf.mxu0  ;;  %v1838_v34 = vpop.f32.mrf.mxu1  ;;  %v1477_v53 = vpack.c.bf16 %v1870_v50, %v1858_v45 }
  0xef   :  { %v1038_v11 = vmul.f32 %v500_v33, %v500_v33  ;;  %v967_v30 = vadd.f32 %v966_v15, %v500_v33 }
  0xf0   :  { %1553 = vst [vmem:[%s2126_s2 + $0xa0] sm:$0xff] %v1477_v53   ;;  %v1904_v53 = vpop.f32.mrf.mxu3 }
  0xf1   :  { %v1101_v38 = vadd.f32 %v1100_v26, %v1038_v11  ;;  %v1512_v27 = vpack.c.bf16 %v1904_v53, %v1892_v0  ;;  %v1045_v26 = vmul.f32 %v1730_v42, %v1730_v42 }
  0xf3   :  { %1560 = vst [vmem:[%s2126_s2 + $0xd8] sm:$0xff] %v1512_v27  }
  0xf5   :  { %v1890_v17 = vpop.f32.mrf.mxu2 }
  0xf6   :  { %v502_v40 = vpop.f32.mrf.mxu0  ;;  %v1854_v41 = vpop.f32.mrf.mxu1 }
  0xf7   :  { %v1402_v43 = vpack.c.bf16 %v502_v40, %v500_v33  ;;  %v1442_v44 = vpack.c.bf16 %v1854_v41, %v1838_v34  ;;  %v1039_v29 = vmul.f32 %v502_v40, %v502_v40  ;;  %v968_v21 = vadd.f32 %v967_v30, %v502_v40 }
  0xf8   :  { %v1922_v4 = vpop.f32.mrf.mxu3 }
  0xf9   :  { %1538 = vst [vmem:[%s2126_s2 + $0x28] sm:$0xff] %v1402_v43   ;;  %v1102_v54 = vadd.f32 %v1101_v38, %v1039_v29  ;;  %v1046_v38 = vmul.f32 %v1740_v49, %v1740_v49 }
  0xfa   :  { %1546 = vst [vmem:[%s2126_s2 + $0x68] sm:$0xff] %v1442_v44  }
  0xfd   :  { %v1902_v52 = vpop.f32.mrf.mxu2 }
  0xfe   :  { %v505_v47 = vpop.f32.mrf.mxu0  ;;  %v1868_v48 = vpop.f32.mrf.mxu1  ;;  %v1482_v57 = vpack.c.bf16 %v1902_v52, %v1890_v17 }
  0xff   :  { %v1040_v39 = vmul.f32 %v505_v47, %v505_v47  ;;  %v969_v58 = vadd.f32 %v968_v21, %v505_v47 }
 0x100   :  { %1554 = vst [vmem:[%s2126_s2 + $0xa8] sm:$0xff] %v1482_v57   ;;  %v1944_v57 = vpop.f32.mrf.mxu3 }
 0x101   :  { %v1103_v33 = vadd.f32 %v1102_v54, %v1040_v39  ;;  %v1517_v27 = vpack.c.bf16 %v1944_v57, %v1922_v4 }
 0x103   :  { %1561 = vst [vmem:[%s2126_s2 + $0xe0] sm:$0xff] %v1517_v27  }
 0x105   :  { %v1920_v25 = vpop.f32.mrf.mxu2 }
 0x106   :  { %v507_v3 = vpop.f32.mrf.mxu0  ;;  %v1886_v5 = vpop.f32.mrf.mxu1 }
 0x107   :  { %v1407_v9 = vpack.c.bf16 %v507_v3, %v505_v47  ;;  %v1447_v14 = vpack.c.bf16 %v1886_v5, %v1868_v48  ;;  %v1041_v56 = vmul.f32 %v507_v3, %v507_v3  ;;  %v970_v40 = vadd.f32 %v969_v58, %v507_v3 }
 0x108   :  { %v1044_v3 = vmul.f32 %v1722_v37, %v1722_v37  ;;  %v1057_v27 = vmul.f32 %v1886_v5, %v1886_v5 }
 0x109   :  { %1539 = vst [vmem:[%s2126_s2 + $0x30] sm:$0xff] %v1407_v9   ;;  %v1104_v61 = vadd.f32 %v1103_v33, %v1041_v56 }
 0x10a   :  { %1547 = vst [vmem:[%s2126_s2 + $0x70] sm:$0xff] %v1447_v14  }
 0x10d   :  { %v1942_v56 = vpop.f32.mrf.mxu2 }
 0x10e   :  { %v510_v43 = vpop.f32.mrf.mxu0  ;;  %v1900_v44 = vpop.f32.mrf.mxu1 }
 0x10f   :  { %v1042_v59 = vmul.f32 %v510_v43, %v510_v43  ;;  %v971_v62 = vadd.f32 %v970_v40, %v510_v43 }
 0x111   :  { %v1105_v1 = vadd.f32 %v1104_v61, %v1042_v59  ;;  %v1050_v61 = vmul.f32 %v1785_v12, %v1785_v12 }
 0x116   :  { %v512_v8 = vpop.f32.mrf.mxu0  ;;  %v1916_v9 = vpop.f32.mrf.mxu1 }
 0x117   :  { %v1412_v14 = vpack.c.bf16 %v512_v8, %v510_v43  ;;  %v972_v6 = vadd.f32 %v971_v62, %v512_v8  ;;  %v1043_v47 = vmul.f32 %v512_v8, %v512_v8  ;;  %v1452_v18 = vpack.c.bf16 %v1916_v9, %v1900_v44 }
 0x119   :  { %1540 = vst [vmem:[%s2126_s2 + $0x38] sm:$0xff] %v1412_v14   ;;  %v973_v11 = vadd.f32 %v972_v6, %v1722_v37  ;;  %v1106_v15 = vadd.f32 %v1105_v1, %v1043_v47  ;;  %v1047_v37 = vmul.f32 %v1745_v55, %v1745_v55  ;;  %v1051_v1 = vmul.f32 %v1794_v16, %v1794_v16  ;;  %v1968_v6 = vpop.f32.mrf.mxu2 }
 0x11a   :  { %1548 = vst [vmem:[%s2126_s2 + $0x78] sm:$0xff] %v1452_v18   ;;  %v1052_v47 = vmul.f32 %v1808_v22, %v1808_v22 }
 0x11b   :  { %v974_v29 = vadd.f32 %v973_v11, %v1730_v42  ;;  %v1107_v30 = vadd.f32 %v1106_v15, %v1044_v3  ;;  %v1487_v42 = vpack.c.bf16 %v1942_v56, %v1920_v25  ;;  %v1053_v11 = vmul.f32 %v1824_v28, %v1824_v28 }
 0x11d   :  { %v975_v39 = vadd.f32 %v974_v29, %v1740_v49  ;;  %v1108_v43 = vadd.f32 %v1107_v30, %v1045_v26  ;;  %v1048_v49 = vmul.f32 %v1757_v63, %v1757_v63  ;;  %1555 = vst [vmem:[%s2126_s2 + $0xb0] sm:$0xff] %v1487_v42   ;;  %v1055_v30 = vmul.f32 %v1854_v41, %v1854_v41 }
 0x11f   :  { %v976_v21 = vadd.f32 %v975_v39, %v1745_v55  ;;  %v1109_v54 = vadd.f32 %v1108_v43, %v1046_v38  ;;  %v1049_v55 = vmul.f32 %v1773_v7, %v1773_v7 }
 0x121   :  { %v977_v58 = vadd.f32 %v976_v21, %v1757_v63  ;;  %v1110_v33 = vadd.f32 %v1109_v54, %v1047_v37 }
 0x123   :  { %v978_v59 = vadd.f32 %v977_v58, %v1773_v7  ;;  %v1111_v40 = vadd.f32 %v1110_v33, %v1048_v49  ;;  %v1970_v7 = vpop.f32.mrf.mxu3 }
 0x125   :  { %v1112_v62 = vadd.f32 %v1111_v40, %v1049_v55  ;;  %v979_v63 = vadd.f32 %v978_v59, %v1785_v12  ;;  %v1059_v59 = vmul.f32 %v1916_v9, %v1916_v9 }
 0x127   :  { %v980_v8 = vadd.f32 %v979_v63, %v1794_v16  ;;  %v1113_v14 = vadd.f32 %v1112_v62, %v1050_v61  ;;  %v1054_v16 = vmul.f32 %v1838_v34, %v1838_v34  ;;  %v1061_v63 = vmul.f32 %v1761_v2, %v1761_v2 }
 0x129   :  { %v981_v18 = vadd.f32 %v980_v8, %v1808_v22  ;;  %v1114_v3 = vadd.f32 %v1113_v14, %v1051_v1  ;;  %v1984_v22 = vpop.f32.mrf.mxu2  ;;  %v1062_v8 = vmul.f32 %v1777_v10, %v1777_v10 }
 0x12b   :  { %v982_v12 = vadd.f32 %v981_v18, %v1824_v28  ;;  %v1115_v15 = vadd.f32 %v1114_v3, %v1052_v47  ;;  %v1986_v43 = vpop.f32.mrf.mxu3  ;;  %v1492_v28 = vpack.c.bf16 %v1984_v22, %v1968_v6  ;;  %v1063_v47 = vmul.f32 %v1787_v13, %v1787_v13 }
 0x12c   :  { %v1522_v37 = vpack.c.bf16 %v1986_v43, %v1970_v7 }
 0x12d   :  { %v983_v26 = vadd.f32 %v982_v12, %v1838_v34  ;;  %v1116_v29 = vadd.f32 %v1115_v15, %v1053_v11  ;;  %v1056_v34 = vmul.f32 %v1868_v48, %v1868_v48  ;;  %1556 = vst [vmem:[%s2126_s2 + $0xb8] sm:$0xff] %v1492_v28  }
 0x12e   :  { %1562 = vst [vmem:[%s2126_s2 + $0xe8] sm:$0xff] %v1522_v37   ;;  %v1068_v37 = vmul.f32 %v1858_v45, %v1858_v45 }
 0x12f   :  { %v984_v38 = vadd.f32 %v983_v26, %v1854_v41  ;;  %v1117_v39 = vadd.f32 %v1116_v29, %v1054_v16  ;;  %v1066_v26 = vmul.f32 %v1828_v31, %v1828_v31 }
 0x131   :  { %v985_v21 = vadd.f32 %v984_v38, %v1868_v48  ;;  %v1118_v54 = vadd.f32 %v1117_v39, %v1055_v30  ;;  %v1058_v48 = vmul.f32 %v1900_v44, %v1900_v44 }
 0x133   :  { %v1119_v41 = vadd.f32 %v1118_v54, %v1056_v34  ;;  %v986_v42 = vadd.f32 %v985_v21, %v1886_v5  ;;  %v2010_v40 = vpop.f32.mrf.mxu3  ;;  %v1060_v5 = vmul.f32 %v1749_v60, %v1749_v60  ;;  %v1069_v34 = vmul.f32 %v1870_v50, %v1870_v50 }
 0x135   :  { %v1120_v49 = vadd.f32 %v1119_v41, %v1057_v27  ;;  %v987_v58 = vadd.f32 %v986_v42, %v1900_v44  ;;  %v1070_v41 = vmul.f32 %v1890_v17, %v1890_v17 }
 0x137   :  { %v1121_v33 = vadd.f32 %v1120_v49, %v1058_v48  ;;  %v988_v55 = vadd.f32 %v987_v58, %v1916_v9  ;;  %v1071_v49 = vmul.f32 %v1902_v52, %v1902_v52 }
 0x139   :  { %v989_v61 = vadd.f32 %v988_v55, %v1749_v60  ;;  %v1122_v62 = vadd.f32 %v1121_v33, %v1059_v59 }
 0x13b   :  { %v990_v1 = vadd.f32 %v989_v61, %v1761_v2  ;;  %v1123_v44 = vadd.f32 %v1122_v62, %v1060_v5  ;;  %v2024_v60 = vpop.f32.mrf.mxu3  ;;  %v1064_v2 = vmul.f32 %v1798_v19, %v1798_v19  ;;  %v1074_v62 = vmul.f32 %v1968_v6, %v1968_v6 }
 0x13c   :  { %v1527_v11 = vpack.c.bf16 %v2024_v60, %v2010_v40 }
 0x13d   :  { %v991_v14 = vadd.f32 %v990_v1, %v1777_v10  ;;  %v1124_v9 = vadd.f32 %v1123_v44, %v1061_v63  ;;  %v1065_v10 = vmul.f32 %v1810_v23, %v1810_v23  ;;  %v1076_v44 = vmul.f32 %v1800_v20, %v1800_v20 }
 0x13e   :  { %1563 = vst [vmem:[%s2126_s2 + $0xf0] sm:$0xff] %v1527_v11  }
 0x13f   :  { %v992_v18 = vadd.f32 %v991_v14, %v1787_v13  ;;  %v1125_v3 = vadd.f32 %v1124_v9, %v1062_v8 }
 0x141   :  { %v993_v12 = vadd.f32 %v992_v18, %v1798_v19  ;;  %v1126_v15 = vadd.f32 %v1125_v3, %v1063_v47  ;;  %v1067_v19 = vmul.f32 %v1840_v35, %v1840_v35 }
 0x143   :  { %v994_v13 = vadd.f32 %v993_v12, %v1810_v23  ;;  %v1127_v16 = vadd.f32 %v1126_v15, %v1064_v2  ;;  %v2043_v28 = vpop.f32.mrf.mxu3 }
 0x145   :  { %v1128_v29 = vadd.f32 %v1127_v16, %v1065_v10  ;;  %v995_v30 = vadd.f32 %v994_v13, %v1828_v31 }
 0x147   :  { %v996_v38 = vadd.f32 %v995_v30, %v1840_v35  ;;  %v1129_v39 = vadd.f32 %v1128_v29, %v1066_v26 }
 0x149   :  { %v997_v23 = vadd.f32 %v996_v38, %v1858_v45  ;;  %v1130_v21 = vadd.f32 %v1129_v39, %v1067_v19 }
 0x14b   :  { %v998_v54 = vadd.f32 %v997_v23, %v1870_v50  ;;  %v1131_v31 = vadd.f32 %v1130_v21, %v1068_v37  ;;  %v632_v45 = vpop.f32.mrf.mxu3  ;;  %v1072_v50 = vmul.f32 %v1920_v25, %v1920_v25 }
 0x14c   :  { %v1532_v48 = vpack.c.bf16 %v632_v45, %v2043_v28 }
 0x14d   :  { %v999_v35 = vadd.f32 %v998_v54, %v1890_v17  ;;  %v1132_v42 = vadd.f32 %v1131_v31, %v1069_v34  ;;  %v1087_v34 = vmul.f32 %v1986_v43, %v1986_v43 }
 0x14e   :  { %1564 = vst [vmem:[%s2126_s2 + $0xf8] sm:$0xff] %v1532_v48   ;;  %v1091_v48 = vmul.f32 %v632_v45, %v632_v45 }
 0x14f   :  { %v1000_v27 = vadd.f32 %v999_v35, %v1902_v52  ;;  %v1133_v58 = vadd.f32 %v1132_v42, %v1070_v41  ;;  %v1073_v52 = vmul.f32 %v1942_v56, %v1942_v56  ;;  %v1088_v41 = vmul.f32 %v2010_v40, %v2010_v40 }
 0x150   :  { %v1089_v42 = vmul.f32 %v2024_v60, %v2024_v60 }
 0x151   :  { %v1134_v33 = vadd.f32 %v1133_v58, %v1071_v49  ;;  %v1001_v55 = vadd.f32 %v1000_v27, %v1920_v25  ;;  %v1075_v25 = vmul.f32 %v1984_v22, %v1984_v22  ;;  %v1090_v49 = vmul.f32 %v2043_v28, %v2043_v28 }
 0x153   :  { %v1135_v17 = vadd.f32 %v1134_v33, %v1072_v50  ;;  %v1002_v59 = vadd.f32 %v1001_v55, %v1942_v56  ;;  %v1077_v56 = vmul.f32 %v1812_v24, %v1812_v24 }
 0x155   :  { %v1136_v5 = vadd.f32 %v1135_v17, %v1073_v52  ;;  %v1003_v61 = vadd.f32 %v1002_v59, %v1968_v6  ;;  %v1078_v6 = vmul.f32 %v1830_v32, %v1830_v32 }
 0x157   :  { %v1137_v63 = vadd.f32 %v1136_v5, %v1074_v62  ;;  %v1004_v1 = vadd.f32 %v1003_v61, %v1984_v22  ;;  %v1079_v22 = vmul.f32 %v1842_v36, %v1842_v36 }
 0x159   :  { %v1005_v8 = vadd.f32 %v1004_v1, %v1800_v20  ;;  %v1138_v14 = vadd.f32 %v1137_v63, %v1075_v25  ;;  %v1080_v20 = vmul.f32 %v1860_v46, %v1860_v46 }
 0x15b   :  { %v1006_v9 = vadd.f32 %v1005_v8, %v1812_v24  ;;  %v1139_v47 = vadd.f32 %v1138_v14, %v1076_v44  ;;  %v1081_v24 = vmul.f32 %v1872_v51, %v1872_v51 }
 0x15d   :  { %v1007_v18 = vadd.f32 %v1006_v9, %v1830_v32  ;;  %v1140_v3 = vadd.f32 %v1139_v47, %v1077_v56  ;;  %v1082_v32 = vmul.f32 %v1892_v0, %v1892_v0 }
 0x15f   :  { %v1008_v11 = vadd.f32 %v1007_v18, %v1842_v36  ;;  %v1141_v2 = vadd.f32 %v1140_v3, %v1078_v6  ;;  %v1083_v36 = vmul.f32 %v1904_v53, %v1904_v53 }
 0x161   :  { %v1009_v12 = vadd.f32 %v1008_v11, %v1860_v46  ;;  %v1142_v15 = vadd.f32 %v1141_v2, %v1079_v22  ;;  %v1084_v46 = vmul.f32 %v1922_v4, %v1922_v4 }
 0x163   :  { %v1010_v10 = vadd.f32 %v1009_v12, %v1872_v51  ;;  %v1143_v13 = vadd.f32 %v1142_v15, %v1080_v20  ;;  %v1085_v51 = vmul.f32 %v1944_v57, %v1944_v57 }
 0x165   :  { %v1144_v16 = vadd.f32 %v1143_v13, %v1081_v24  ;;  %v1011_v26 = vadd.f32 %v1010_v10, %v1892_v0  ;;  %v1086_v0 = vmul.f32 %v1970_v7, %v1970_v7 }
 0x167   :  { %v1012_v29 = vadd.f32 %v1011_v26, %v1904_v53  ;;  %v1145_v30 = vadd.f32 %v1144_v16, %v1082_v32 }
 0x169   :  { %v1013_v19 = vadd.f32 %v1012_v29, %v1922_v4  ;;  %v1146_v38 = vadd.f32 %v1145_v30, %v1083_v36 }
 0x16b   :  { %v1014_v39 = vadd.f32 %v1013_v19, %v1944_v57  ;;  %v1147_v37 = vadd.f32 %v1146_v38, %v1084_v46 }
 0x16d   :  { %v1015_v23 = vadd.f32 %v1014_v39, %v1970_v7  ;;  %v1148_v21 = vadd.f32 %v1147_v37, %v1085_v51 }
 0x16f   :  { %v1016_v53 = vadd.f32 %v1015_v23, %v1986_v43  ;;  %v1149_v54 = vadd.f32 %v1148_v21, %v1086_v0 }
 0x171   :  { %v1150_v4 = vadd.f32 %v1149_v54, %v1087_v34  ;;  %v1017_v31 = vadd.f32 %v1016_v53, %v2010_v40 }
 0x173   :  { %v1151_v57 = vadd.f32 %v1150_v4, %v1088_v41  ;;  %v1018_v35 = vadd.f32 %v1017_v31, %v2024_v60 }
 0x175   :  { %v1152_v7 = vadd.f32 %v1151_v57, %v1089_v42  ;;  %v1019_v27 = vadd.f32 %v1018_v35, %v2043_v28 }
 0x177   :  { %v1153_v43 = vadd.f32 %v1152_v7, %v1090_v49  ;;  %v1020_v58 = vadd.f32 %v1019_v27, %v632_v45 }
 0x179   :  { %v1021_v33 = vrot.slane %v1020_v58, 4  ;;  %v1154_v55 = vadd.f32 %v1153_v43, %v1091_v48 }
 0x17b   :  { %v1022_v50 = vadd.f32 %v1021_v33, %v1020_v58  ;;  %v1155_v17 = vrot.slane %v1154_v55, 4 }
 0x17d   :  { %v1023_v40 = vrot.slane %v1022_v50, 2  ;;  %v1156_v59 = vadd.f32 %v1155_v17, %v1154_v55 }
 0x17f   :  { %v1024_v52 = vadd.f32 %v1023_v40, %v1022_v50  ;;  %v1157_v5 = vrot.slane %v1156_v59, 2 }
 0x181   :  { %v1025_v61 = vrot.slane %v1024_v52, 1  ;;  %v1158_v62 = vadd.f32 %v1157_v5, %v1156_v59 }
 0x183   :  { %v1026_v60 = vadd.f32 %v1025_v61, %v1024_v52  ;;  %v1159_v63 = vrot.slane %v1158_v62, 1 }
 0x185   :  { %1027 = vst [vmem:[%s2127_s3] sm:$0x1] %v1026_v60  ;;  %v1160_v28 = vadd.f32 %v1159_v63, %v1158_v62 }
 0x187   :  { %1161 = vst [vmem:[%s2128_s4] sm:$0x1] %v1160_v28 }

</bundles_post_ra>
